<compile_context>
chip_gen: v7x
topology: tpu7x:2x2x1
jax: 0.10.0
libtpu: 0.0.40
codegen_flags: <defaults>
</compile_context>

<pallas_src>
import functools

import numpy as np
import jax
import jax.numpy as jnp
from jax import lax
from jax.experimental import pallas as pl
from jax.experimental.pallas import tpu as pltpu


def _earth_attn3d_kernel(x_ref, add_ref, w1_ref, b1_ref, w2_ref, b2_ref, o_ref,
                         *, heads, head_dim):
    # x_ref   : (1, M, C)   bf16   all windows of one batch element (M = W*N)
    # add_ref : (H, M, M)   f32    bias + window mask + block-diag -1e30 (resident)
    # w1_ref  : (C, 3C)     bf16   packed QKV weights, scale folded into q cols
    # b1_ref  : (1, 3C)     f32    packed QKV bias (q part pre-scaled)
    # w2_ref  : (C, C)      bf16   output projection (already transposed)
    # b2_ref  : (1, C)      f32
    # o_ref   : (1, M, C)   f32
    hd = head_dim
    C = heads * hd

    x2 = x_ref[0]                                                    # (M, C) bf16

    # Fused QKV projection: single wide MXU call, f32 accumulation.
    qkv = jnp.dot(x2, w1_ref[...],
                  preferred_element_type=jnp.float32) + b1_ref[...]  # (M, 3C) f32

    head_outs = []
    for h in range(heads):                       # static unroll (tiny head count)
        q = qkv[:, h * hd:(h + 1) * hd].astype(jnp.bfloat16)         # (M, hd)
        k = qkv[:, C + h * hd:C + (h + 1) * hd].astype(jnp.bfloat16)
        v = qkv[:, 2 * C + h * hd:2 * C + (h + 1) * hd].astype(jnp.bfloat16)

        # Full-width block-diagonal scores: (M, hd) x (hd, M) -> (M, M).
        s = lax.dot_general(q, k, (((1,), (1,)), ((), ())),
                            preferred_element_type=jnp.float32)
        s = s + add_ref[h]                        # bias + mask + off-diag -1e30
        s = s - jnp.max(s, axis=-1, keepdims=True)
        p = jnp.exp(s)
        p = p * pl.reciprocal(jnp.sum(p, axis=-1, keepdims=True), approx=True)
        # dropout(p): identity in eval mode

        head_outs.append(jnp.dot(p.astype(jnp.bfloat16), v,
                                 preferred_element_type=jnp.float32))  # (M, hd)

    # Lane-concat heads (stays within one vreg tile at C=32), single W2 matmul.
    o_cat = jnp.concatenate(head_outs, axis=-1).astype(jnp.bfloat16)   # (M, C)
    out = jnp.dot(o_cat, w2_ref[...],
                  preferred_element_type=jnp.float32) + b2_ref[...]
    # dropout(out): identity in eval mode
    o_ref[0] = out.astype(o_ref.dtype)


def _construct_position_index(window_size):
    """NumPy transcription of EarthAttention3DRelative._construct_index."""
    wz, wh, ww = (int(w) for w in window_size)
    coords = np.stack(np.meshgrid(np.arange(wz), np.arange(wh), np.arange(ww),
                                  indexing='ij'))                 # (3, wz, wh, ww)
    cf = coords.reshape(3, -1)                                    # (3, N)
    rel = cf[:, :, None] - cf[:, None, :]                         # (3, N, N)
    rel = rel.transpose(1, 2, 0).astype(np.int64)                 # (N, N, 3)
    rel[:, :, 0] += wz - 1
    rel[:, :, 1] += wh - 1
    rel[:, :, 2] += ww - 1
    rel[:, :, 0] *= (2 * wh - 1) * (2 * ww - 1)
    rel[:, :, 1] *= (2 * ww - 1)
    return rel.sum(-1).reshape(-1).astype(np.int32)               # (N*N,)


def earth_attention_3d_relative(x, mask, bias_table, pos_index, w1, b1, w2, b2,
                                *, heads):
    """x: (B_total, N, C); mask: (n_windows, N, N);
    bias_table: (table_len, 1, heads); w1: (3C, C); w2: (C, C)."""
    B, N, C = x.shape
    n_windows = int(mask.shape[0])
    n_batch = B // n_windows
    hd = C // heads
    M = n_windows * N
    scale = float(hd) ** -0.5

    # earth-specific relative position bias -> (heads, N, N)  (one-time gather)
    bias = bias_table[pos_index].reshape(N, N, heads).transpose(2, 0, 1)
    bias = bias.astype(jnp.float32)

    # Combined additive term (heads, M, M): bias + per-window mask on the
    # diagonal blocks, -1e30 off-diagonal (exp -> 0 after max-subtract).
    neg = jnp.float32(-1e30)
    diag_content = bias[None, :, :, :] + mask.astype(jnp.float32)[:, None, :, :]  # (W,H,N,N)
    add5 = jnp.full((n_windows, heads, N, n_windows, N), neg, jnp.float32)
    idx = jnp.arange(n_windows)
    add5 = add5.at[idx, :, :, idx, :].set(diag_content)            # (W,H,N,W,N)
    add = jnp.transpose(add5, (1, 0, 2, 3, 4)).reshape(heads, M, M)

    # Packed QKV weights (C, 3C); fold the 1/sqrt(hd) scale into the q columns
    # (scale is a power of two so the bf16 cast loses nothing extra).
    scale_vec = jnp.concatenate([jnp.full((C,), scale, jnp.float32),
                                 jnp.ones((2 * C,), jnp.float32)])
    w1p = (w1.T.astype(jnp.float32) * scale_vec[None, :]).astype(jnp.bfloat16)  # (C, 3C)
    b1p = (b1.astype(jnp.float32) * scale_vec).reshape(1, 3 * C)                # (1, 3C)
    w2p = w2.T.astype(jnp.bfloat16)                                             # (C, C)
    b2p = b2.astype(jnp.float32).reshape(1, C)                                  # (1, C)

    # Fold windows into the matmul M dimension; bf16 input halves DMA bytes.
    xk = x.reshape(n_batch, M, C).astype(jnp.bfloat16)

    kernel = functools.partial(_earth_attn3d_kernel, heads=heads, head_dim=hd)

    out = pl.pallas_call(
        kernel,
        out_shape=jax.ShapeDtypeStruct((n_batch, M, C), x.dtype),
        grid=(n_batch,),
        in_specs=[
            pl.BlockSpec((1, M, C), lambda b: (b, 0, 0)),        # x (one batch element)
            pl.BlockSpec((heads, M, M), lambda b: (0, 0, 0)),    # bias+mask term (resident)
            pl.BlockSpec((C, 3 * C), lambda b: (0, 0)),          # W1 packed      (resident)
            pl.BlockSpec((1, 3 * C), lambda b: (0, 0)),          # b1 packed      (resident)
            pl.BlockSpec((C, C), lambda b: (0, 0)),              # W2             (resident)
            pl.BlockSpec((1, C), lambda b: (0, 0)),              # b2             (resident)
        ],
        out_specs=pl.BlockSpec((1, M, C), lambda b: (b, 0, 0)),
        compiler_params=pltpu.CompilerParams(
            dimension_semantics=("parallel",)),                  # >=2 steps -> both v7x TCs
    )(xk, add, w1p, b1p, w2p, b2p)

    return out.reshape(B, N, C)


def _reference(x, mask, bias_table, pos_index, w1, b1, w2, b2, heads):
    """Pure-JAX f32 transcription of the PyTorch forward (eval mode)."""
    B, N, C = x.shape
    hd = C // heads
    scale = float(hd) ** -0.5
    xp = x @ w1.T + b1                                           # (B, N, 3C)
    qkv = xp.reshape(B, N, 3, heads, hd).transpose(2, 0, 3, 1, 4)
    q, k, v = qkv[0] * scale, qkv[1], qkv[2]                     # (B, H, N, hd)
    attn = q @ jnp.swapaxes(k, -1, -2)                           # (B, H, N, N)
    bias = bias_table[pos_index].reshape(N, N, heads).transpose(2, 0, 1)
    attn = attn + bias[None]
    nw = mask.shape[0]
    attn = attn.reshape(B // nw, nw, heads, N, N) + mask[None, :, None]
    attn = attn.reshape(B, heads, N, N)
    attn = jax.nn.softmax(attn, axis=-1)
    y = jnp.swapaxes(attn @ v, 1, 2).reshape(B, N, C)
    return y @ w2.T + b2


if __name__ == "__main__":
    # Config: dim=32, heads=2, window_size=(2, 4, 4) -> N = 32 patches/window
    dim = 32
    heads = 2
    window_size = (2, 4, 4)
    n_tokens = window_size[0] * window_size[1] * window_size[2]   # 32
    n_windows = 4
    n_batch = 2
    B_total = n_batch * n_windows
    table_len = ((2 * window_size[2] - 1) * (2 * window_size[1] - 1)
                 * (2 * window_size[0] - 1))                      # 147

    key = jax.random.PRNGKey(0)
    kx, km, kb, kw1, kb1, kw2, kb2 = jax.random.split(key, 7)

    x = jax.random.normal(kx, (B_total, n_tokens, dim), jnp.float32)
    # shifted-window style additive mask: 0 for visible, -100 for masked
    mask = jnp.where(
        jax.random.uniform(km, (n_windows, n_tokens, n_tokens)) > 0.7,
        -100.0, 0.0).astype(jnp.float32)

    # earth_specific_bias Parameter: (table_len, type_of_windows=1, heads)
    bias_table = (0.02 * jax.random.normal(kb, (table_len, 1, heads))).astype(jnp.float32)
    pos_index = _construct_position_index(window_size)

    # nn.Linear(dim, 3*dim) / nn.Linear(dim, dim) parameter shapes
    w1 = jax.random.normal(kw1, (3 * dim, dim), jnp.float32) * 0.05
    b1 = jax.random.normal(kb1, (3 * dim,), jnp.float32) * 0.05
    w2 = jax.random.normal(kw2, (dim, dim), jnp.float32) * 0.05
    b2 = jax.random.normal(kb2, (dim,), jnp.float32) * 0.05

    out = earth_attention_3d_relative(x, mask, bias_table, pos_index,
                                      w1, b1, w2, b2, heads=heads)
    out = jax.block_until_ready(out)

    ref = _reference(x, mask, bias_table, pos_index, w1, b1, w2, b2, heads)
    assert out.shape == (B_total, n_tokens, dim)
    err = float(jnp.max(jnp.abs(out - ref)))
    # Kernel uses bf16 MXU operands (f32 accumulation) per the v6e/v7x perf
    # guidance; expected max abs error vs the f32 reference is ~5e-4, so a
    # 2e-3 tolerance leaves comfortable margin.
    assert jnp.allclose(out, ref, atol=2e-3, rtol=2e-3), err

    print("KERNEL_OK")
</pallas_src>

<mosaic_0001>
module attributes {stable_mosaic.version = 11 : i64} {
  func.func @_earth_attn3d_kernel(%arg0: i32, %arg1: memref<1x128x32xbf16, #tpu.memory_space<vmem>>, %arg2: memref<2x128x128xf32, #tpu.memory_space<vmem>>, %arg3: memref<32x96xbf16, #tpu.memory_space<vmem>>, %arg4: memref<1x96xf32, #tpu.memory_space<vmem>>, %arg5: memref<32x32xbf16, #tpu.memory_space<vmem>>, %arg6: memref<1x32xf32, #tpu.memory_space<vmem>>, %arg7: memref<1x128x32xf32, #tpu.memory_space<vmem>>) attributes {dimension_semantics = [#tpu.dimension_semantics<parallel>], iteration_bounds = array<i64: 2>, scalar_prefetch = 0 : i64, scratch_operands = 0 : i64, tpu.core_type = #tpu.core_type<tc>, window_params = [{transform_indices = @transform_0, window_bounds = array<i64: 1, 128, 32>}, {pipeline_mode = #tpu.pipeline_mode<synchronous>, transform_indices = @transform_1, window_bounds = array<i64: 2, 128, 128>}, {pipeline_mode = #tpu.pipeline_mode<synchronous>, transform_indices = @transform_2, window_bounds = array<i64: 32, 96>}, {pipeline_mode = #tpu.pipeline_mode<synchronous>, transform_indices = @transform_3, window_bounds = array<i64: 1, 96>}, {pipeline_mode = #tpu.pipeline_mode<synchronous>, transform_indices = @transform_4, window_bounds = array<i64: 32, 32>}, {pipeline_mode = #tpu.pipeline_mode<synchronous>, transform_indices = @transform_5, window_bounds = array<i64: 1, 32>}, {transform_indices = @transform_6, window_bounds = array<i64: 1, 128, 32>}]} {
    %c0 = arith.constant 0 : index
    %c0_0 = arith.constant 0 : index
    %c0_1 = arith.constant 0 : index
    %0 = vector.load %arg1[%c0, %c0_0, %c0_1] : memref<1x128x32xbf16, #tpu.memory_space<vmem>>, vector<1x128x32xbf16>
    %1 = vector.shape_cast %0 : vector<1x128x32xbf16> to vector<128x32xbf16>
    %c0_2 = arith.constant 0 : index
    %c0_3 = arith.constant 0 : index
    %2 = vector.load %arg3[%c0_2, %c0_3] : memref<32x96xbf16, #tpu.memory_space<vmem>>, vector<32x96xbf16>
    %cst = arith.constant dense<0.000000e+00> : vector<128x96xf32>
    %3 = tpu.matmul %1, %2, %cst {dimension_numbers = #tpu.dot_dimension_numbers<[1], [0], [0], [1], [0, 0, 1, 1], [], []>} : vector<128x32xbf16>, vector<32x96xbf16>, vector<128x96xf32> -> vector<128x96xf32>
    %c0_4 = arith.constant 0 : index
    %c0_5 = arith.constant 0 : index
    %4 = vector.load %arg4[%c0_4, %c0_5] : memref<1x96xf32, #tpu.memory_space<vmem>>, vector<1x96xf32>
    %5 = vector.broadcast %4 : vector<1x96xf32> to vector<128x96xf32>
    %6 = arith.addf %3, %5 : vector<128x96xf32>
    %7 = vector.extract_strided_slice %6 {offsets = [0, 0], sizes = [128, 16], strides = [1, 1]} : vector<128x96xf32> to vector<128x16xf32>
    %8 = arith.truncf %7 : vector<128x16xf32> to vector<128x16xbf16>
    %9 = vector.extract_strided_slice %6 {offsets = [0, 32], sizes = [128, 16], strides = [1, 1]} : vector<128x96xf32> to vector<128x16xf32>
    %10 = arith.truncf %9 : vector<128x16xf32> to vector<128x16xbf16>
    %11 = vector.extract_strided_slice %6 {offsets = [0, 64], sizes = [128, 16], strides = [1, 1]} : vector<128x96xf32> to vector<128x16xf32>
    %12 = arith.truncf %11 : vector<128x16xf32> to vector<128x16xbf16>
    %cst_6 = arith.constant dense<0.000000e+00> : vector<128x128xf32>
    %13 = tpu.matmul %8, %10, %cst_6 {dimension_numbers = #tpu.dot_dimension_numbers<[1], [1], [0], [0], [0, 0, 1, 0], [], []>} : vector<128x16xbf16>, vector<128x16xbf16>, vector<128x128xf32> -> vector<128x128xf32>
    %c0_7 = arith.constant 0 : index
    %c0_8 = arith.constant 0 : index
    %c0_9 = arith.constant 0 : index
    %14 = vector.load %arg2[%c0_7, %c0_8, %c0_9] : memref<2x128x128xf32, #tpu.memory_space<vmem>>, vector<1x128x128xf32>
    %15 = vector.shape_cast %14 : vector<1x128x128xf32> to vector<128x128xf32>
    %16 = arith.addf %13, %15 : vector<128x128xf32>
    %cst_10 = arith.constant dense<0xFF800000> : vector<128xf32>
    %17 = vector.multi_reduction <maximumf>, %16, %cst_10 [1] : vector<128x128xf32> to vector<128xf32>
    %18 = vector.shape_cast %17 : vector<128xf32> to vector<128x1xf32>
    %19 = vector.broadcast %18 : vector<128x1xf32> to vector<128x128xf32>
    %20 = arith.subf %16, %19 : vector<128x128xf32>
    %21 = math.exp %20 : vector<128x128xf32>
    %cst_11 = arith.constant dense<0.000000e+00> : vector<128xf32>
    %22 = vector.multi_reduction <add>, %21, %cst_11 [1] : vector<128x128xf32> to vector<128xf32>
    %23 = vector.shape_cast %22 : vector<128xf32> to vector<128x1xf32>
    %24 = tpu.reciprocal %23 {approx = true} : vector<128x1xf32> -> vector<128x1xf32>
    %25 = vector.broadcast %24 : vector<128x1xf32> to vector<128x128xf32>
    %26 = arith.mulf %21, %25 : vector<128x128xf32>
    %27 = arith.truncf %26 : vector<128x128xf32> to vector<128x128xbf16>
    %cst_12 = arith.constant dense<0.000000e+00> : vector<128x16xf32>
    %28 = tpu.matmul %27, %12, %cst_12 {dimension_numbers = #tpu.dot_dimension_numbers<[1], [0], [0], [1], [0, 0, 1, 1], [], []>} : vector<128x128xbf16>, vector<128x16xbf16>, vector<128x16xf32> -> vector<128x16xf32>
    %29 = vector.extract_strided_slice %6 {offsets = [0, 16], sizes = [128, 16], strides = [1, 1]} : vector<128x96xf32> to vector<128x16xf32>
    %30 = arith.truncf %29 : vector<128x16xf32> to vector<128x16xbf16>
    %31 = vector.extract_strided_slice %6 {offsets = [0, 48], sizes = [128, 16], strides = [1, 1]} : vector<128x96xf32> to vector<128x16xf32>
    %32 = arith.truncf %31 : vector<128x16xf32> to vector<128x16xbf16>
    %33 = vector.extract_strided_slice %6 {offsets = [0, 80], sizes = [128, 16], strides = [1, 1]} : vector<128x96xf32> to vector<128x16xf32>
    %34 = arith.truncf %33 : vector<128x16xf32> to vector<128x16xbf16>
    %cst_13 = arith.constant dense<0.000000e+00> : vector<128x128xf32>
    %35 = tpu.matmul %30, %32, %cst_13 {dimension_numbers = #tpu.dot_dimension_numbers<[1], [1], [0], [0], [0, 0, 1, 0], [], []>} : vector<128x16xbf16>, vector<128x16xbf16>, vector<128x128xf32> -> vector<128x128xf32>
    %c1 = arith.constant 1 : index
    %c0_14 = arith.constant 0 : index
    %c0_15 = arith.constant 0 : index
    %36 = vector.load %arg2[%c1, %c0_14, %c0_15] : memref<2x128x128xf32, #tpu.memory_space<vmem>>, vector<1x128x128xf32>
    %37 = vector.shape_cast %36 : vector<1x128x128xf32> to vector<128x128xf32>
    %38 = arith.addf %35, %37 : vector<128x128xf32>
    %cst_16 = arith.constant dense<0xFF800000> : vector<128xf32>
    %39 = vector.multi_reduction <maximumf>, %38, %cst_16 [1] : vector<128x128xf32> to vector<128xf32>
    %40 = vector.shape_cast %39 : vector<128xf32> to vector<128x1xf32>
    %41 = vector.broadcast %40 : vector<128x1xf32> to vector<128x128xf32>
    %42 = arith.subf %38, %41 : vector<128x128xf32>
    %43 = math.exp %42 : vector<128x128xf32>
    %cst_17 = arith.constant dense<0.000000e+00> : vector<128xf32>
    %44 = vector.multi_reduction <add>, %43, %cst_17 [1] : vector<128x128xf32> to vector<128xf32>
    %45 = vector.shape_cast %44 : vector<128xf32> to vector<128x1xf32>
    %46 = tpu.reciprocal %45 {approx = true} : vector<128x1xf32> -> vector<128x1xf32>
    %47 = vector.broadcast %46 : vector<128x1xf32> to vector<128x128xf32>
    %48 = arith.mulf %43, %47 : vector<128x128xf32>
    %49 = arith.truncf %48 : vector<128x128xf32> to vector<128x128xbf16>
    %cst_18 = arith.constant dense<0.000000e+00> : vector<128x16xf32>
    %50 = tpu.matmul %49, %34, %cst_18 {dimension_numbers = #tpu.dot_dimension_numbers<[1], [0], [0], [1], [0, 0, 1, 1], [], []>} : vector<128x128xbf16>, vector<128x16xbf16>, vector<128x16xf32> -> vector<128x16xf32>
    %51 = tpu.concatenate %28, %50 in 1 : vector<128x16xf32>, vector<128x16xf32> -> vector<128x32xf32>
    %52 = arith.truncf %51 : vector<128x32xf32> to vector<128x32xbf16>
    %c0_19 = arith.constant 0 : index
    %c0_20 = arith.constant 0 : index
    %53 = vector.load %arg5[%c0_19, %c0_20] : memref<32x32xbf16, #tpu.memory_space<vmem>>, vector<32x32xbf16>
    %cst_21 = arith.constant dense<0.000000e+00> : vector<128x32xf32>
    %54 = tpu.matmul %52, %53, %cst_21 {dimension_numbers = #tpu.dot_dimension_numbers<[1], [0], [0], [1], [0, 0, 1, 1], [], []>} : vector<128x32xbf16>, vector<32x32xbf16>, vector<128x32xf32> -> vector<128x32xf32>
    %c0_22 = arith.constant 0 : index
    %c0_23 = arith.constant 0 : index
    %55 = vector.load %arg6[%c0_22, %c0_23] : memref<1x32xf32, #tpu.memory_space<vmem>>, vector<1x32xf32>
    %56 = vector.broadcast %55 : vector<1x32xf32> to vector<128x32xf32>
    %57 = arith.addf %54, %56 : vector<128x32xf32>
    %c0_24 = arith.constant 0 : index
    %c0_25 = arith.constant 0 : index
    %c0_26 = arith.constant 0 : index
    %58 = vector.load %arg7[%c0_24, %c0_25, %c0_26] : memref<1x128x32xf32, #tpu.memory_space<vmem>>, vector<1x128x32xf32>
    %59 = vector.shape_cast %58 : vector<1x128x32xf32> to vector<128x32xf32>
    %60 = vector.shape_cast %57 : vector<128x32xf32> to vector<1x128x32xf32>
    tpu.vector_store %arg7[%c0_24, %c0_25, %c0_26], %60 {strides = array<i32>} : memref<1x128x32xf32, #tpu.memory_space<vmem>>, vector<1x128x32xf32>,
    return
  }
  func.func @transform_0(%arg0: i32) -> (i32, i32, i32) {
    %c0_i32 = arith.constant 0 : i32
    %c0_i32_0 = arith.constant 0 : i32
    %c0_i32_1 = arith.constant 0 : i32
    return %arg0, %c0_i32, %c0_i32_0 : i32, i32, i32
  }
  func.func @transform_1(%arg0: i32) -> (i32, i32, i32) {
    %c0_i32 = arith.constant 0 : i32
    %c0_i32_0 = arith.constant 0 : i32
    %c0_i32_1 = arith.constant 0 : i32
    %c0_i32_2 = arith.constant 0 : i32
    return %c0_i32, %c0_i32_0, %c0_i32_1 : i32, i32, i32
  }
  func.func @transform_2(%arg0: i32) -> (i32, i32) {
    %c0_i32 = arith.constant 0 : i32
    %c0_i32_0 = arith.constant 0 : i32
    %c0_i32_1 = arith.constant 0 : i32
    return %c0_i32, %c0_i32_0 : i32, i32
  }
  func.func @transform_3(%arg0: i32) -> (i32, i32) {
    %c0_i32 = arith.constant 0 : i32
    %c0_i32_0 = arith.constant 0 : i32
    %c0_i32_1 = arith.constant 0 : i32
    return %c0_i32, %c0_i32_0 : i32, i32
  }
  func.func @transform_4(%arg0: i32) -> (i32, i32) {
    %c0_i32 = arith.constant 0 : i32
    %c0_i32_0 = arith.constant 0 : i32
    %c0_i32_1 = arith.constant 0 : i32
    return %c0_i32, %c0_i32_0 : i32, i32
  }
  func.func @transform_5(%arg0: i32) -> (i32, i32) {
    %c0_i32 = arith.constant 0 : i32
    %c0_i32_0 = arith.constant 0 : i32
    %c0_i32_1 = arith.constant 0 : i32
    return %c0_i32, %c0_i32_0 : i32, i32
  }
  func.func @transform_6(%arg0: i32) -> (i32, i32, i32) {
    %c0_i32 = arith.constant 0 : i32
    %c0_i32_0 = arith.constant 0 : i32
    %c0_i32_1 = arith.constant 0 : i32
    return %arg0, %c0_i32, %c0_i32_0 : i32, i32, i32
  }
}

</mosaic_0001>

<bundles_post_ra>
// kernel: tpu_custom_call.1
= control target key start
LH: loop header
LB: loop body
LE: loop exit
PB: predicated region body
PF: predicated region fallthrough
CT: control target
= control target key end

     0   :  { %11 = vsyncpa [#allocation3], 0  ;;  %s2354_s21 = smov 0   ;;  %s2954_s0 = inlined_call_operand.vmem [shape: bf16[2,128,32], index: 0, kind: input, shape index: {}]   ;;  %s2955_s1 = inlined_call_operand.hbm [shape: f32[2,128,128], index: 1, kind: input, shape index: {}]   ;;  %s2956_s2 = inlined_call_operand.vmem [shape: bf16[32,96], index: 2, kind: input, shape index: {}]   ;;  %s2957_s3 = inlined_call_operand.vmem [shape: f32[1,96], index: 3, kind: input, shape index: {}]   ;;  %s2958_s4 = inlined_call_operand.vmem [shape: bf16[32,32], index: 4, kind: input, shape index: {}]   ;;  %s2959_s5 = inlined_call_operand.vmem [shape: f32[1,32], index: 5, kind: input, shape index: {}]   ;;  %s2960_s6 = inlined_call_operand.vmem [shape: f32[2,128,32], index: 6, kind: output, shape index: {}]  }
   0x1 LB: > { %s2360_s22 = sadd.s32 4294967295, %s2308_s21   ;;  %p1720_p0 = scmp.ge.s32.totalorder %s2308_s21, 1  ;;  %s2308_s21 = sphi %s2354_s21, %s17_s21  }
   0x2   : > { %p179_p1 = scmp.lt.s32.totalorder %s2308_s21, 3  ;;  %s2310_s23 = smov [#allocation2]  }
   0x3   : > { %s191_s24 = sshll.u32 %s2310_s23, 4  ;;  %p2961_p3 = scmp.eq.s32.totalorder %s2360_s22, 0  ;;  %s192_s24 = int_to_ptr.vmem [resolvable:$true] %s191_s24 }
   0x4   : > { %p2364_p2 = pnand %p1720_p0, %p179_p1  ;;  %s2270_s29 = scalar_lea.hbm %s2955_s1, 4096 }
   0x5   : > { %p2271_p6 = scmp.ne.s32.totalorder %s2955_s1, %s2270_s29  ;;  %p2277_p10 = scmp.lt.u32.totalorder %s2270_s29, %s2955_s1 }
   0x6   : > { %s2963_s25 = scalar_select %p2364_p2, 1, 0 }
   0x7   : > { %p2067_p4 = pneg %p2364_p2 }
   0x9   : > { %p2373_p5 = pnand %p2961_p3, %p2067_p4 }
   0xb   : > { %p2272_p7 = pneg %p2373_p5 }
   0xd   : > { %p2273_p8 = pnand %p2272_p7, %p2271_p6 }
   0xf   : > { %p2274_p9 = pneg %p2273_p8 }
  0x11   : > { %p2279_p11 = pnand %p2277_p10, %p2274_p9 }
  0x13   : > { %2282 = shalt.err (!%p2279_p11)
}
  0x14   : > { %s2283_s10 = scalar_lea.vmem %s192_s24, 4096  ;;  %p2291_p1 = scmp.lt.s32.totalorder %s192_s24, %s192_s24 }
  0x15   : > { %p2284_p12 = scmp.ne.s32.totalorder %s192_s24, %s2283_s10  ;;  %p2292_p4 = scmp.lt.s32.totalorder %s2283_s10, %s2283_s10 }
  0x17   : > { %p2286_p13 = pnand %p2284_p12, %p2272_p7  ;;  %p2293_p3 = por %p2292_p4, %p2291_p1 }
  0x19   : > { %p2287_p0 = pneg %p2286_p13 }
  0x1b   : > { %p2294_p2 = pnand %p2293_p3, %p2287_p0 }
  0x1d   : > { %2297 = shalt.err (!%p2294_p2)
}
  0x1e   : > { %s2311_s11 = smov 128   ;;  %s2312_s12 = smov 8  }
  0x1f   : > { %2070 = dma.hbm_to_vmem [thread:$0]  (!%p2373_p5), %s2955_s1, 4096, %s192_s24, [#allocation3], %s2311_s11, %s2311_s11, %s2312_s12  }
  0x20   : > { %p2965_p6 = scmp.ne.s32.totalorder %s2963_s25, 0 }
  0x21   : > { %p2966_p8 = scmp.eq.s32.totalorder (!%p2965_p6), %s2360_s22, 0 }
  0x22   : > { %227 = sbr.rel (%p2965_p6) target bundleno = 2297 (0x8f9), region = 44 }
  0x29   : > { %2303 = dma.done.wait (%p2966_p8), [#allocation3], 4096   ;;  %p2967_p7 = pmov %p2966_p8 }
  0x2a   : > { %p257_p2 = scmp.lt.s32.totalorder %s2360_s22, 1  ;;  %v2130_v0 = vld [vmem:[%s2956_s2] sm:$0xff]   ;;  %v2131_v1 = vld [vmem:[%s2956_s2 + $0x8] sm:$0xff]   ;;  %vm347_vm0 = vcmask 261120   ;;  %vm517_vm1 = vcmask 130048   ;;  %s2313_s27 = smov 96  }
  0x2b   : > { %2305 = vsyncadd (%p2967_p7), [#allocation3], 4294963200  ;;  %1863 = vmatprep.subr.bf16.mxu0 %v2130_v0  ;;  %v1729_v11 = vld [vmem:[%s2957_s3] ss:$0 sm:$0xff]  ;;  %s2314_s28 = smov 64   ;;  %s2315_s29 = smov 80  }
  0x2c   : > { %s2969_s22 = smov (!%p257_p2, %s2360_s22), 1  ;;  %1864 = vmatpush3.bf16.msra.mxu0 %v2130_v0  ;;  %s2316_s30 = smov 112  }
  0x2d   : > { %s1777_s15 = sshll.u32 %s2969_s22, 6  ;;  %1865 = vmatprep.subr.bf16.mxu0 %v2131_v1  ;;  %s2317_s7 = smov 48  }
  0x2e   : > { %s261_s18 = scalar_lea.vmem %s2954_s0, %s1777_s15  ;;  %s2318_s12 = smov 16  }
  0x2f   : > { %v2132_v2 = vld [vmem:[%s261_s18] sm:$0xff]   ;;  %v2133_v3 = vld [vmem:[%s261_s18 + $0x8] sm:$0xff]   ;;  %v2134_v4 = vld [vmem:[%s261_s18 + $0x10] sm:$0xff]   ;;  %s1778_s13 = sshll.u32 %s2969_s22, 7 }
  0x30   : > { %1867 = vmatprep.mubr.msk.bf16.mxu0 %vm347_vm0, %v2132_v2  ;;  %1866 = vmatpush3.bf16.msra.mxu0 %v2131_v1  ;;  %v2135_v5 = vld [vmem:[%s261_s18 + $0x18] sm:$0xff]   ;;  %v2136_v6 = vld [vmem:[%s261_s18 + $0x20] sm:$0xff]   ;;  %v2137_v7 = vld [vmem:[%s261_s18 + $0x28] sm:$0xff]  }
  0x31   : > { %v2138_v8 = vld [vmem:[%s261_s18 + $0x30] sm:$0xff]   ;;  %v2139_v9 = vld [vmem:[%s261_s18 + $0x38] sm:$0xff]   ;;  %s2917_s18 = scalar_lea.vmem %s2960_s6, %s1778_s13 }
  0x33   : > { %1868 = vmatmul.mubr.msk.bf16.vlgmr.msra.gmra.mrb[0].mxu0 %vm347_vm0, %v2133_v3 }
  0x34   : > { %1871 = vmatprep.mubr.msk.bf16.mxu0 %vm347_vm0, %v2134_v4 }
  0x3b   : > { %1872 = vmatmul.mubr.msk.bf16.gmra.mrb[4].mxu0 %vm347_vm0, %v2135_v5 }
  0x3c   : > { %1875 = vmatprep.mubr.msk.bf16.mxu0 %vm347_vm0, %v2136_v6 }
  0x43   : > { %1876 = vmatmul.mubr.msk.bf16.gmra.mrb[8].mxu0 %vm347_vm0, %v2137_v7 }
  0x44   : > { %1879 = vmatprep.mubr.msk.bf16.mxu0 %vm347_vm0, %v2138_v8 }
  0x4b   : > { %1880 = vmatmul.mubr.msk.bf16.gmra.mrb[12].mxu0 %vm347_vm0, %v2139_v9 }
 0x106   : > { %v1869_v10 = vpop.f32.mrb[0].mxu0 }
 0x107   : > { %v406_v12 = vpop.f32.mrb[1].mxu0  ;;  %v415_v14 = vadd.f32 %v1869_v10, %v1729_v11 }
 0x108   : > { %v1870_v13 = vpop.f32.mrb[2].mxu0  ;;  %v407_v17 = vadd.f32 %v1729_v11, %v406_v12 }
 0x109   : > { %v418_v15 = vadd.f32 %v1870_v13, %v1729_v11  ;;  %v409_v16 = vpop.f32.mrb[3].mxu0 }
 0x10a   : > { %v410_v18 = vadd.f32 %v1729_v11, %v409_v16  ;;  %v477_v16 = vld [vmem:[#allocation2] sm:$0xff] }
 0x10b   : > { %v2424_v19 = vpack.c.bf16 %v418_v15, %v415_v14  ;;  %v478_v15 = vld [vmem:[#allocation2 + $0x8] sm:$0xff] }
 0x10c   : > { %v2426_v20 = vpack.c.bf16 %v410_v18, %v407_v17 }
 0x10e   : > { %501 = vrot.lane.b32.xlu0 %v2426_v20, %s2313_s27  ;;  %1899 = vmatprep.mubr.msk.bf16.mxu1 %vm517_vm1, %v2426_v20  ;;  %v1873_v21 = vpop.f32.mrb[4].mxu0 }
 0x10f   : > { %v431_v22 = vadd.f32 %v1873_v21, %v1729_v11  ;;  %v422_v23 = vpop.f32.mrb[5].mxu0 }
 0x110   : > { %v423_v24 = vadd.f32 %v1729_v11, %v422_v23  ;;  %v1874_v25 = vpop.f32.mrb[6].mxu0  ;;  %v480_v23 = vld [vmem:[#allocation2 + $0x18] sm:$0xff] }
 0x111   : > { %v434_v26 = vadd.f32 %v1874_v25, %v1729_v11  ;;  %v425_v27 = vpop.f32.mrb[7].mxu0 }
 0x112   : > { %v426_v28 = vadd.f32 %v1729_v11, %v425_v27  ;;  %503 = vrot.lane.b32.xlu0 %v2424_v19, %s2313_s27 }
 0x113   : > { %v2434_v29 = vpack.c.bf16 %v434_v26, %v431_v22 }
 0x114   : > { %v2436_v30 = vpack.c.bf16 %v426_v28, %v423_v24 }
 0x116   : > { %505 = vrot.lane.b32.xlu1 %v2436_v30, %s2313_s27  ;;  %v1877_v31 = vpop.f32.mrb[8].mxu0 }
 0x117   : > { %v447_v32 = vadd.f32 %v1877_v31, %v1729_v11  ;;  %v438_v33 = vpop.f32.mrb[9].mxu0 }
 0x118   : > { %v439_v34 = vadd.f32 %v1729_v11, %v438_v33  ;;  %v1878_v35 = vpop.f32.mrb[10].mxu0 }
 0x119   : > { %v450_v36 = vadd.f32 %v1878_v35, %v1729_v11  ;;  %v441_v37 = vpop.f32.mrb[11].mxu0 }
 0x11a   : > { %507 = vrot.lane.b32.xlu1 %v2434_v29, %s2313_s27  ;;  %v442_v38 = vadd.f32 %v1729_v11, %v441_v37 }
 0x11b   : > { %v2442_v39 = vpack.c.bf16 %v450_v36, %v447_v32 }
 0x11c   : > { %v2444_v40 = vpack.c.bf16 %v442_v38, %v439_v34 }
 0x11e   : > { %v1881_v41 = vpop.f32.mrb[12].mxu0  ;;  %511 = vrot.lane.b32.xlu1 %v2442_v39, %s2313_s27  ;;  %509 = vrot.lane.b32.xlu0 %v2444_v40, %s2313_s27 }
 0x11f   : > { %v463_v42 = vadd.f32 %v1881_v41, %v1729_v11  ;;  %v454_v43 = vpop.f32.mrb[13].mxu0  ;;  %v483_v41 = vld [vmem:[#allocation2 + $0x30] sm:$0xff] }
 0x120   : > { %v455_v44 = vadd.f32 %v1729_v11, %v454_v43  ;;  %v1882_v45 = vpop.f32.mrb[14].mxu0  ;;  %v481_v43 = vld [vmem:[#allocation2 + $0x20] sm:$0xff] }
 0x121   : > { %v466_v46 = vadd.f32 %v1882_v45, %v1729_v11  ;;  %v457_v47 = vpop.f32.mrb[15].mxu0 }
 0x122   : > { %v458_v48 = vadd.f32 %v1729_v11, %v457_v47  ;;  %v479_v11 = vld [vmem:[#allocation2 + $0x10] sm:$0xff] }
 0x123   : > { %v2450_v49 = vpack.c.bf16 %v466_v46, %v463_v42  ;;  %v487_v47 = vld [vmem:[#allocation2 + $0x50] sm:$0xff] }
 0x124   : > { %v2452_v50 = vpack.c.bf16 %v458_v48, %v455_v44  ;;  %v484_v44 = vld [vmem:[#allocation2 + $0x38] sm:$0xff]  ;;  %v482_v48 = vld [vmem:[#allocation2 + $0x28] sm:$0xff] }
 0x125   : > { %515 = vrot.lane.b32.xlu1 %v2450_v49, %s2313_s27 }
 0x126   : > { %513 = vrot.lane.b32.xlu0 %v2452_v50, %s2313_s27 }
 0x129   : > { %815 = vrot.lane.b32.xlu1 %v2426_v20, %s2314_s28 }
 0x12a   : > { %817 = vrot.lane.b32.xlu0 %v2424_v19, %s2314_s28 }
 0x12d   : > { %819 = vrot.lane.b32.xlu1 %v2436_v30, %s2314_s28 }
 0x12e   : > { %821 = vrot.lane.b32.xlu0 %v2434_v29, %s2314_s28 }
 0x131   : > { %823 = vrot.lane.b32.xlu1 %v2444_v40, %s2314_s28 }
 0x135   : > { %825 = vrot.lane.b32.xlu1 %v2442_v39, %s2314_s28 }
 0x139   : > { %829 = vrot.lane.b32.xlu1 %v2450_v49, %s2314_s28 }
 0x13d   : > { %827 = vrot.lane.b32.xlu1 %v2452_v50, %s2314_s28 }
 0x180   : > { %v502_v51 = vpop.permute.xlu0 %501 }
 0x181   : > { %2047 = vmatprep.subr.msk.bf16.mxu1 %vm517_vm1, %v502_v51  ;;  %v543_v52 = vsel %vm517_vm1, %v502_v51, 0 }
 0x182   : > { %1884 = vmatpush3.bf16.xpose.msra.mxu1 %v543_v52 }
 0x184   : > { %v504_v53 = vpop.permute.xlu0 %503 }
 0x185   : > { %2048 = vmatprep.subr.msk.bf16.mxu1 %vm517_vm1, %v504_v53  ;;  %v546_v55 = vsel %vm517_vm1, %v504_v53, 0  ;;  %v485_v53 = vld [vmem:[#allocation2 + $0x40] sm:$0xff] }
 0x188   : > { %v506_v54 = vpop.permute.xlu1 %505 }
 0x189   : > { %v549_v57 = vsel %vm517_vm1, %v506_v54, 0 }
 0x18a   : > { %1886 = vmatpush3.bf16.xpose.msra.mxu1 %v546_v55 }
 0x18b   : > { %2049 = vmatprep.subr.msk.bf16.mxu1 %vm517_vm1, %v506_v54  ;;  %v488_v54 = vld [vmem:[#allocation2 + $0x58] sm:$0xff] }
 0x18c   : > { %v508_v56 = vpop.permute.xlu1 %507 }
 0x18d   : > { %v552_v62 = vsel %vm517_vm1, %v508_v56, 0 }
 0x190   : > { %v512_v58 = vpop.permute.xlu1 %511  ;;  %v510_v59 = vpop.permute.xlu0 %509 }
 0x191   : > { %v555_v2 = vsel %vm517_vm1, %v510_v59, 0  ;;  %v558_v6 = vsel %vm517_vm1, %v512_v58, 0 }
 0x192   : > { %1888 = vmatpush3.bf16.xpose.msra.mxu1 %v549_v57  ;;  %v491_v57 = vld [vmem:[#allocation2 + $0x70] sm:$0xff] }
 0x193   : > { %2050 = vmatprep.subr.msk.bf16.mxu1 %vm517_vm1, %v508_v56 }
 0x197   : > { %v516_v60 = vpop.permute.xlu1 %515 }
 0x198   : > { %v514_v61 = vpop.permute.xlu0 %513  ;;  %v564_v10 = vsel %vm517_vm1, %v516_v60, 0 }
 0x199   : > { %v561_v9 = vsel %vm517_vm1, %v514_v61, 0 }
 0x19a   : > { %1890 = vmatpush3.bf16.xpose.msra.mxu1 %v552_v62  ;;  %v492_v62 = vld [vmem:[#allocation2 + $0x78] sm:$0xff] }
 0x19b   : > { %v816_v63 = vpop.permute.xlu1 %815  ;;  %2051 = vmatprep.subr.msk.bf16.mxu1 %vm517_vm1, %v510_v59 }
 0x19c   : > { %1915 = vmatprep.subr.bf16.mxu0 %v816_v63  ;;  %v818_v0 = vpop.permute.xlu0 %817 }
 0x19d   : > { %1916 = vmatpush3.bf16.msra.mxu0 %v816_v63 }
 0x19e   : > { %1917 = vmatprep.subr.bf16.mxu0 %v818_v0 }
 0x19f   : > { %v820_v1 = vpop.permute.xlu1 %819 }
 0x1a0   : > { %v822_v4 = vpop.permute.xlu0 %821 }
 0x1a1   : > { %1918 = vmatpush3.bf16.msra.mxu0 %v818_v0 }
 0x1a2   : > { %1892 = vmatpush3.bf16.xpose.msra.mxu1 %v555_v2  ;;  %1919 = vmatprep.subr.bf16.mxu0 %v820_v1 }
 0x1a3   : > { %v824_v3 = vpop.permute.xlu1 %823  ;;  %2052 = vmatprep.subr.msk.bf16.mxu1 %vm517_vm1, %v512_v58  ;;  %v486_v58 = vld [vmem:[#allocation2 + $0x48] sm:$0xff] }
 0x1a5   : > { %1920 = vmatpush3.bf16.msra.mxu0 %v820_v1  ;;  %v490_v1 = vld [vmem:[#allocation2 + $0x68] sm:$0xff] }
 0x1a6   : > { %1921 = vmatprep.subr.bf16.mxu0 %v822_v4 }
 0x1a7   : > { %v826_v5 = vpop.permute.xlu1 %825 }
 0x1a9   : > { %1922 = vmatpush3.bf16.msra.mxu0 %v822_v4 }
 0x1aa   : > { %1894 = vmatpush3.bf16.xpose.msra.mxu1 %v558_v6  ;;  %1923 = vmatprep.subr.bf16.mxu0 %v824_v3 }
 0x1ab   : > { %v830_v7 = vpop.permute.xlu1 %829  ;;  %2053 = vmatprep.subr.msk.bf16.mxu1 %vm517_vm1, %v514_v61  ;;  %v489_v61 = vld [vmem:[#allocation2 + $0x60] sm:$0xff] }
 0x1ad   : > { %1924 = vmatpush3.bf16.msra.mxu0 %v824_v3 }
 0x1ae   : > { %1925 = vmatprep.subr.bf16.mxu0 %v826_v5 }
 0x1af   : > { %v828_v8 = vpop.permute.xlu1 %827 }
 0x1b1   : > { %1926 = vmatpush3.bf16.msra.mxu0 %v826_v5 }
 0x1b2   : > { %1896 = vmatpush3.bf16.xpose.msra.mxu1 %v561_v9  ;;  %1927 = vmatprep.subr.bf16.mxu0 %v828_v8 }
 0x1b3   : > { %2054 = vmatprep.subr.msk.bf16.mxu1 %vm517_vm1, %v516_v60 }
 0x1b5   : > { %1928 = vmatpush3.bf16.msra.mxu0 %v828_v8 }
 0x1b6   : > { %1929 = vmatprep.subr.bf16.mxu0 %v830_v7 }
 0x1b9   : > { %1930 = vmatpush3.bf16.msra.mxu0 %v830_v7 }
 0x1ba   : > { %1898 = vmatpush3.bf16.xpose.msra.mxu1 %v564_v10 }
 0x1c1   : > { %1900 = vmatmul.mubr.msk.bf16.vlgmr.msra.gmra.mrb[0].mxu1 %vm517_vm1, %v2424_v19 }
 0x1c2   : > { %1903 = vmatprep.mubr.msk.bf16.mxu1 %vm517_vm1, %v2436_v30 }
 0x1c9   : > { %1904 = vmatmul.mubr.msk.bf16.gmra.mrb[4].mxu1 %vm517_vm1, %v2434_v29 }
 0x1ca   : > { %1907 = vmatprep.mubr.msk.bf16.mxu1 %vm517_vm1, %v2444_v40 }
 0x1d1   : > { %1908 = vmatmul.mubr.msk.bf16.gmra.mrb[8].mxu1 %vm517_vm1, %v2442_v39 }
 0x1d2   : > { %1911 = vmatprep.mubr.msk.bf16.mxu1 %vm517_vm1, %v2452_v50 }
 0x1d9   : > { %1912 = vmatmul.mubr.msk.bf16.gmra.mrb[12].mxu1 %vm517_vm1, %v2450_v49 }
 0x294   : > { %v1901_v12 = vpop.f32.mrb[0].mxu1 }
 0x295   : > { %v2496_v13 = vadd.f32 %v1901_v12, %v479_v11  ;;  %v600_v14 = vpop.f32.mrb[1].mxu1 }
 0x296   : > { %v1902_v17 = vpop.f32.mrb[2].mxu1  ;;  %v2501_v22 = vadd.f32 %v600_v14, %v477_v16 }
 0x297   : > { %667 = vmax.xlane.f32.xlu0 %v2496_v13  ;;  %v603_v18 = vpop.f32.mrb[3].mxu1  ;;  %v2505_v25 = vadd.f32 %v1902_v17, %v480_v23 }
 0x298   : > { %v2499_v21 = vadd.f32 %v603_v18, %v478_v15 }
 0x29a   : > { %665 = vmax.xlane.f32.xlu1 %v2499_v21 }
 0x29b   : > { %663 = vmax.xlane.f32.xlu0 %v2501_v22 }
 0x29c   : > { %v1905_v24 = vpop.f32.mrb[4].mxu1 }
 0x29d   : > { %v616_v26 = vpop.f32.mrb[5].mxu1  ;;  %v2512_v42 = vadd.f32 %v1905_v24, %v483_v41 }
 0x29e   : > { %v1906_v27 = vpop.f32.mrb[6].mxu1  ;;  %v2515_v45 = vadd.f32 %v616_v26, %v481_v43 }
 0x29f   : > { %v619_v28 = vpop.f32.mrb[7].mxu1  ;;  %669 = vmax.xlane.f32.xlu0 %v2505_v25  ;;  %v2517_v46 = vadd.f32 %v1906_v27, %v484_v44 }
 0x2a0   : > { %v2523_v52 = vadd.f32 %v619_v28, %v482_v48 }
 0x2a4   : > { %v1909_v31 = vpop.f32.mrb[8].mxu1 }
 0x2a5   : > { %v632_v32 = vpop.f32.mrb[9].mxu1  ;;  %v2521_v51 = vadd.f32 %v1909_v31, %v487_v47 }
 0x2a6   : > { %v1910_v33 = vpop.f32.mrb[10].mxu1  ;;  %v2527_v55 = vadd.f32 %v632_v32, %v485_v53 }
 0x2a7   : > { %v635_v34 = vpop.f32.mrb[11].mxu1  ;;  %v2529_v56 = vadd.f32 %v1910_v33, %v488_v54 }
 0x2a8   : > { %v2535_v60 = vadd.f32 %v635_v34, %v486_v58 }
 0x2ab   : > { %971 = vrot.lane.b32.xlu1 %v2424_v19, %s2315_s29 }
 0x2ac   : > { %v1913_v35 = vpop.f32.mrb[12].mxu1 }
 0x2ad   : > { %v648_v36 = vpop.f32.mrb[13].mxu1  ;;  %v2533_v59 = vadd.f32 %v1913_v35, %v491_v57 }
 0x2ae   : > { %v1914_v37 = vpop.f32.mrb[14].mxu1  ;;  %v2539_v63 = vadd.f32 %v648_v36, %v489_v61 }
 0x2af   : > { %v651_v38 = vpop.f32.mrb[15].mxu1  ;;  %v2541_v0 = vadd.f32 %v1914_v37, %v492_v62 }
 0x2b0   : > { %v2545_v2 = vadd.f32 %v651_v38, %v490_v1 }
 0x2b5   : > { %969 = vrot.lane.b32.xlu0 %v2426_v20, %s2315_s29 }
 0x2cf   : > { %675 = vmax.xlane.f32.xlu1 %v2512_v42 }
 0x2d3   : > { %671 = vmax.xlane.f32.xlu1 %v2515_v45 }
 0x2d4   : > { %677 = vmax.xlane.f32.xlu0 %v2517_v46 }
 0x2d7   : > { %683 = vmax.xlane.f32.xlu1 %v2521_v51 }
 0x2d8   : > { %673 = vmax.xlane.f32.xlu0 %v2523_v52 }
 0x2db   : > { %679 = vmax.xlane.f32.xlu1 %v2527_v55 }
 0x2dc   : > { %685 = vmax.xlane.f32.xlu0 %v2529_v56 }
 0x2df   : > { %691 = vmax.xlane.f32.xlu1 %v2533_v59 }
 0x2e0   : > { %681 = vmax.xlane.f32.xlu0 %v2535_v60 }
 0x2e3   : > { %687 = vmax.xlane.f32.xlu1 %v2539_v63 }
 0x2e4   : > { %693 = vmax.xlane.f32.xlu0 %v2541_v0 }
 0x2e8   : > { %689 = vmax.xlane.f32.xlu0 %v2545_v2 }
 0x2f4   : > { %973 = vrot.lane.b32.xlu1 %v2436_v30, %s2315_s29 }
 0x324   : > { %v668_v3 = vpop.xlane.xlu0 %667 }
 0x325   : > { %v697_v4 = vsub.f32 %v2496_v13, %v668_v3 }
 0x327   : > { %v715_v5 = vmul.f32 1.442695, %v697_v4  ;;  %v666_v8 = vpop.xlane.xlu1 %665 }
 0x328   : > { %v664_v6 = vpop.xlane.xlu0 %663  ;;  %v696_v11 = vsub.f32 %v2499_v21, %v666_v8 }
 0x329   : > { %2142 = vpow2.f32 %v715_v5  ;;  %v695_v7 = vsub.f32 %v2501_v22, %v664_v6 }
 0x32a   : > { %v713_v16 = vmul.f32 1.442695, %v696_v11 }
 0x32b   : > { %v711_v9 = vmul.f32 1.442695, %v695_v7  ;;  %v2570_v22 = vpop.permute.xlu1 %971 }
 0x32c   : > { %v670_v10 = vpop.xlane.xlu0 %669 }
 0x32d   : > { %2144 = vpow2.f32 %v711_v9  ;;  %v698_v12 = vsub.f32 %v2505_v25, %v670_v10 }
 0x32f   : > { %v717_v14 = vmul.f32 1.442695, %v698_v12 }
 0x330   : > { %v2554_v15 = vpop.permute.xlu0 %969 }
 0x331   : > { %2146 = vpow2.f32 %v717_v14  ;;  %2055 = vmatprep.subr.msk.bf16.mxu0 %vm517_vm1, %v2554_v15 }
 0x332   : > { %2148 = vpow2.f32 %v713_v16 }
 0x333   : > { %v2558_v13 = vpop.eup %2142 }
 0x334   : > { %747 = vadd.xlane.f32.xlu0 %v2558_v13 }
 0x337   : > { %v2561_v17 = vpop.eup %2144 }
 0x338   : > { %743 = vadd.xlane.f32.xlu1 %v2561_v17 }
 0x33b   : > { %v2564_v18 = vpop.eup %2146 }
 0x33c   : > { %749 = vadd.xlane.f32.xlu0 %v2564_v18  ;;  %v2567_v21 = vpop.eup %2148 }
 0x340   : > { %745 = vadd.xlane.f32.xlu0 %v2567_v21 }
 0x35c   : > { %v676_v23 = vpop.xlane.xlu1 %675 }
 0x35d   : > { %v701_v24 = vsub.f32 %v2512_v42, %v676_v23 }
 0x35f   : > { %v723_v25 = vmul.f32 1.442695, %v701_v24 }
 0x360   : > { %v672_v26 = vpop.xlane.xlu1 %671 }
 0x361   : > { %2150 = vpow2.f32 %v723_v25  ;;  %v699_v27 = vsub.f32 %v2515_v45, %v672_v26  ;;  %v678_v28 = vpop.xlane.xlu0 %677 }
 0x362   : > { %v702_v31 = vsub.f32 %v2517_v46, %v678_v28 }
 0x363   : > { %v719_v32 = vmul.f32 1.442695, %v699_v27 }
 0x364   : > { %v725_v33 = vmul.f32 1.442695, %v702_v31  ;;  %v684_v47 = vpop.xlane.xlu1 %683 }
 0x365   : > { %2152 = vpow2.f32 %v719_v32  ;;  %v674_v34 = vpop.xlane.xlu0 %673 }
 0x366   : > { %v700_v35 = vsub.f32 %v2523_v52, %v674_v34  ;;  %2154 = vpow2.f32 %v725_v33  ;;  %v705_v52 = vsub.f32 %v2521_v51, %v684_v47 }
 0x368   : > { %v721_v36 = vmul.f32 1.442695, %v700_v35  ;;  %v680_v53 = vpop.xlane.xlu1 %679  ;;  %v731_v57 = vmul.f32 1.442695, %v705_v52 }
 0x369   : > { %v686_v43 = vpop.xlane.xlu0 %685  ;;  %v703_v58 = vsub.f32 %v2527_v55, %v680_v53 }
 0x36a   : > { %2156 = vpow2.f32 %v721_v36  ;;  %v706_v62 = vsub.f32 %v2529_v56, %v686_v43 }
 0x36b   : > { %v2576_v37 = vpop.eup %2150  ;;  %v727_v61 = vmul.f32 1.442695, %v703_v58 }
 0x36c   : > { %755 = vadd.xlane.f32.xlu0 %v2576_v37  ;;  %v692_v1 = vpop.xlane.xlu1 %691  ;;  %v733_v3 = vmul.f32 1.442695, %v706_v62 }
 0x36d   : > { %v682_v44 = vpop.xlane.xlu0 %681  ;;  %v709_v51 = vsub.f32 %v2533_v59, %v692_v1 }
 0x36e   : > { %v704_v4 = vsub.f32 %v2535_v60, %v682_v44  ;;  %v1010_v44 = vsel %vm517_vm1, %v2554_v15, 0 }
 0x36f   : > { %v2579_v38 = vpop.eup %2152  ;;  %v739_v7 = vmul.f32 1.442695, %v709_v51 }
 0x370   : > { %751 = vadd.xlane.f32.xlu0 %v2579_v38  ;;  %v2582_v41 = vpop.eup %2154  ;;  %v688_v6 = vpop.xlane.xlu1 %687 }
 0x371   : > { %v694_v45 = vpop.xlane.xlu0 %693  ;;  %v707_v56 = vsub.f32 %v2539_v63, %v688_v6 }
 0x372   : > { %v710_v59 = vsub.f32 %v2541_v0, %v694_v45 }
 0x373   : > { %v735_v60 = vmul.f32 1.442695, %v707_v56 }
 0x374   : > { %v2584_v42 = vpop.eup %2156  ;;  %757 = vadd.xlane.f32.xlu0 %v2582_v41  ;;  %v741_v10 = vmul.f32 1.442695, %v710_v59  ;;  %v974_v14 = vpop.permute.xlu1 %973 }
 0x375   : > { %753 = vadd.xlane.f32.xlu1 %v2584_v42  ;;  %v690_v46 = vpop.xlane.xlu0 %689  ;;  %v1016_v15 = vsel %vm517_vm1, %v974_v14, 0 }
 0x376   : > { %v708_v48 = vsub.f32 %v2545_v2, %v690_v46  ;;  %v729_v2 = vmul.f32 1.442695, %v704_v4 }
 0x378   : > { %v737_v54 = vmul.f32 1.442695, %v708_v48 }
 0x37a   : > { %2158 = vpow2.f32 %v737_v54 }
 0x37b   : > { %2160 = vpow2.f32 %v731_v57 }
 0x37c   : > { %2162 = vpow2.f32 %v727_v61 }
 0x37d   : > { %2164 = vpow2.f32 %v733_v3 }
 0x37e   : > { %2166 = vpow2.f32 %v729_v2 }
 0x37f   : > { %2168 = vpow2.f32 %v739_v7 }
 0x380   : > { %2170 = vpow2.f32 %v735_v60 }
 0x381   : > { %2172 = vpow2.f32 %v741_v10 }
 0x384   : > { %v2599_v5 = vpop.eup %2158 }
 0x385   : > { %v2603_v55 = vpop.eup %2160 }
 0x386   : > { %975 = vrot.lane.b32.xlu1 %v2434_v29, %s2315_s29  ;;  %v2607_v8 = vpop.eup %2162 }
 0x387   : > { %v2611_v9 = vpop.eup %2164 }
 0x388   : > { %v2614_v11 = vpop.eup %2166 }
 0x389   : > { %v2619_v63 = vpop.eup %2168 }
 0x38a   : > { %977 = vrot.lane.b32.xlu0 %v2444_v40, %s2315_s29  ;;  %v2624_v0 = vpop.eup %2170 }
 0x38b   : > { %v2629_v12 = vpop.eup %2172 }
 0x38e   : > { %979 = vrot.lane.b32.xlu0 %v2442_v39, %s2315_s29 }
 0x3aa   : > { %769 = vadd.xlane.f32.xlu1 %v2599_v5 }
 0x3ad   : > { %763 = vadd.xlane.f32.xlu0 %v2603_v55 }
 0x3b1   : > { %759 = vadd.xlane.f32.xlu0 %v2607_v8 }
 0x3b5   : > { %765 = vadd.xlane.f32.xlu0 %v2611_v9 }
 0x3b9   : > { %761 = vadd.xlane.f32.xlu0 %v2614_v11 }
 0x3bb   : > { %983 = vrot.lane.b32.xlu1 %v2450_v49, %s2315_s29 }
 0x3bd   : > { %771 = vadd.xlane.f32.xlu0 %v2619_v63 }
 0x3bf   : > { %961 = vrot.lane.b32.xlu1 %v2444_v40, %s2316_s30 }
 0x3c1   : > { %767 = vadd.xlane.f32.xlu0 %v2624_v0  ;;  %v748_v16 = vpop.xlane.xlu0 %747 }
 0x3c3   : > { %965 = vrot.lane.b32.xlu1 %v2452_v50, %s2316_s30 }
 0x3c5   : > { %773 = vadd.xlane.f32.xlu0 %v2629_v12  ;;  %v744_v23 = vpop.xlane.xlu1 %743 }
 0x3c7   : > { %1284 = vrot.lane.b32.xlu1 %v2424_v19, %s2317_s7 }
 0x3c9   : > { %v750_v24 = vpop.xlane.xlu0 %749 }
 0x3ca   : > { %2174 = vrcp.f32 %v750_v24 }
 0x3cb   : > { %2176 = vrcp.f32 %v744_v23 }
 0x3cc   : > { %2178 = vrcp.f32 %v748_v16 }
 0x3cd   : > { %v746_v25 = vpop.xlane.xlu0 %745 }
 0x3ce   : > { %2180 = vrcp.f32 %v746_v25 }
 0x3d4   : > { %v2175_v26 = vpop.eup %2174 }
 0x3d5   : > { %v2177_v27 = vpop.eup %2176  ;;  %v794_v32 = vmul.f32 %v2175_v26, %v2564_v18 }
 0x3d6   : > { %v2179_v28 = vpop.eup %2178  ;;  %v791_v33 = vmul.f32 %v2177_v27, %v2561_v17 }
 0x3d7   : > { %v793_v35 = vmul.f32 %v2179_v28, %v2558_v13  ;;  %v1013_v13 = vsel %vm517_vm1, %v2570_v22, 0 }
 0x3d8   : > { %v2181_v31 = vpop.eup %2180 }
 0x3d9   : > { %v792_v34 = vmul.f32 %v2181_v31, %v2567_v21  ;;  %v808_v43 = vpack.c.bf16 %v794_v32, %v793_v35 }
 0x3db   : > { %981 = vrot.lane.b32.xlu0 %v2452_v50, %s2315_s29  ;;  %v807_v36 = vpack.c.bf16 %v792_v34, %v791_v33 }
 0x3dd   : > { %1931 = vmatprep.mubr.bf16.mxu0 %v807_v36 }
 0x3de   : > { %1932 = vmatmul.mubr.bf16.vlgmr.msra.gmra.mrb[16].mxu0 %v808_v43 }
 0x3df   : > { %1948 = vmatpush3.bf16.xpose.msra.mxu0 %v1010_v44  ;;  %953 = vrot.lane.b32.xlu0 %v2426_v20, %s2316_s30 }
 0x3e0   : > { %2056 = vmatprep.subr.msk.bf16.mxu0 %vm517_vm1, %v2570_v22 }
 0x3e3   : > { %955 = vrot.lane.b32.xlu0 %v2424_v19, %s2316_s30 }
 0x3e7   : > { %1950 = vmatpush3.bf16.xpose.msra.mxu0 %v1013_v13  ;;  %957 = vrot.lane.b32.xlu0 %v2436_v30, %s2316_s30 }
 0x3e8   : > { %2057 = vmatprep.subr.msk.bf16.mxu0 %vm517_vm1, %v974_v14 }
 0x3eb   : > { %959 = vrot.lane.b32.xlu0 %v2434_v29, %s2316_s30 }
 0x3ef   : > { %1952 = vmatpush3.bf16.xpose.msra.mxu0 %v1016_v15  ;;  %963 = vrot.lane.b32.xlu0 %v2442_v39, %s2316_s30 }
 0x3f3   : > { %967 = vrot.lane.b32.xlu0 %v2450_v49, %s2316_s30 }
 0x3f7   : > { %1282 = vrot.lane.b32.xlu0 %v2426_v20, %s2317_s7 }
 0x3f9   : > { %v756_v19 = vpop.xlane.xlu0 %755 }
 0x3fa   : > { %2182 = vrcp.f32 %v756_v19 }
 0x3fd   : > { %v752_v17 = vpop.xlane.xlu0 %751 }
 0x3fe   : > { %2184 = vrcp.f32 %v752_v17 }
 0x401   : > { %v758_v18 = vpop.xlane.xlu0 %757 }
 0x402   : > { %2186 = vrcp.f32 %v758_v18  ;;  %v754_v21 = vpop.xlane.xlu1 %753 }
 0x403   : > { %2188 = vrcp.f32 %v754_v21 }
 0x404   : > { %v2183_v47 = vpop.eup %2182 }
 0x405   : > { %v978_v46 = vpop.permute.xlu0 %977  ;;  %v797_v61 = vmul.f32 %v2183_v47, %v2576_v37 }
 0x406   : > { %v976_v22 = vpop.permute.xlu1 %975  ;;  %v1022_v58 = vsel %vm517_vm1, %v978_v46, 0 }
 0x407   : > { %v1019_v45 = vsel %vm517_vm1, %v976_v22, 0  ;;  %2058 = vmatprep.subr.msk.bf16.mxu0 %vm517_vm1, %v976_v22 }
 0x408   : > { %1954 = vmatpush3.bf16.xpose.msra.mxu0 %v1019_v45  ;;  %v2185_v48 = vpop.eup %2184 }
 0x409   : > { %2059 = vmatprep.subr.msk.bf16.mxu0 %vm517_vm1, %v978_v46  ;;  %v795_v54 = vmul.f32 %v2185_v48, %v2579_v38  ;;  %v980_v62 = vpop.permute.xlu0 %979 }
 0x40a   : > { %v1025_v4 = vsel %vm517_vm1, %v980_v62, 0 }
 0x40c   : > { %v2187_v20 = vpop.eup %2186 }
 0x40d   : > { %v2189_v52 = vpop.eup %2188  ;;  %v798_v53 = vmul.f32 %v2187_v20, %v2582_v41 }
 0x40e   : > { %v796_v57 = vmul.f32 %v2189_v52, %v2584_v42 }
 0x40f   : > { %v810_v3 = vpack.c.bf16 %v798_v53, %v797_v61 }
 0x410   : > { %1956 = vmatpush3.bf16.xpose.msra.mxu0 %v1022_v58  ;;  %v809_v1 = vpack.c.bf16 %v796_v57, %v795_v54 }
 0x411   : > { %2060 = vmatprep.subr.msk.bf16.mxu0 %vm517_vm1, %v980_v62 }
 0x412   : > { %1935 = vmatprep.mubr.bf16.mxu0 %v809_v1 }
 0x413   : > { %1936 = vmatmul.mubr.bf16.gmra.mrb[20].mxu0 %v810_v3 }
 0x418   : > { %1958 = vmatpush3.bf16.xpose.msra.mxu0 %v1025_v4 }
 0x437   : > { %v770_v37 = vpop.xlane.xlu1 %769 }
 0x43a   : > { %v764_v41 = vpop.xlane.xlu0 %763 }
 0x43b   : > { %v984_v32 = vpop.permute.xlu1 %983 }
 0x43c   : > { %v1031_v13 = vsel %vm517_vm1, %v984_v32, 0 }
 0x43e   : > { %v760_v51 = vpop.xlane.xlu0 %759 }
 0x43f   : > { %v962_v17 = vpop.permute.xlu1 %961 }
 0x442   : > { %v766_v38 = vpop.xlane.xlu0 %765 }
 0x443   : > { %2190 = vrcp.f32 %v766_v38  ;;  %v966_v18 = vpop.permute.xlu1 %965 }
 0x444   : > { %2192 = vrcp.f32 %v760_v51  ;;  %v937_v51 = vld [vmem:[#allocation2 + $0x80] sm:$0xff] }
 0x445   : > { %2194 = vrcp.f32 %v764_v41  ;;  %v939_v41 = vld [vmem:[#allocation2 + $0x90] sm:$0xff] }
 0x446   : > { %v762_v42 = vpop.xlane.xlu0 %761 }
 0x447   : > { %2196 = vrcp.f32 %v762_v42 }
 0x448   : > { %2198 = vrcp.f32 %v770_v37 }
 0x44a   : > { %v772_v2 = vpop.xlane.xlu0 %771 }
 0x44d   : > { %v2191_v6 = vpop.eup %2190 }
 0x44e   : > { %v768_v7 = vpop.xlane.xlu0 %767  ;;  %v2193_v56 = vpop.eup %2192  ;;  %v802_v10 = vmul.f32 %v2191_v6, %v2611_v9 }
 0x44f   : > { %2200 = vrcp.f32 %v768_v7  ;;  %v2195_v60 = vpop.eup %2194  ;;  %v799_v16 = vmul.f32 %v2193_v56, %v2607_v8  ;;  %v940_v56 = vld [vmem:[#allocation2 + $0x98] sm:$0xff] }
 0x450   : > { %2202 = vrcp.f32 %v772_v2  ;;  %v801_v24 = vmul.f32 %v2195_v60, %v2603_v55  ;;  %v938_v2 = vld [vmem:[#allocation2 + $0x88] sm:$0xff] }
 0x451   : > { %v2197_v59 = vpop.eup %2196 }
 0x452   : > { %v774_v14 = vpop.xlane.xlu0 %773  ;;  %v800_v23 = vmul.f32 %v2197_v59, %v2614_v11  ;;  %v812_v26 = vpack.c.bf16 %v802_v10, %v801_v24  ;;  %v2199_v28 = vpop.eup %2198 }
 0x453   : > { %2204 = vrcp.f32 %v774_v14  ;;  %v804_v55 = vmul.f32 %v2199_v28, %v2599_v5  ;;  %v943_v14 = vld [vmem:[#allocation2 + $0xb0] sm:$0xff] }
 0x454   : > { %v811_v25 = vpack.c.bf16 %v800_v23, %v799_v16  ;;  %v944_v23 = vld [vmem:[#allocation2 + $0xb8] sm:$0xff] }
 0x456   : > { %1939 = vmatprep.mubr.bf16.mxu0 %v811_v25  ;;  %v982_v27 = vpop.permute.xlu0 %981 }
 0x457   : > { %v1028_v31 = vsel %vm517_vm1, %v982_v27, 0  ;;  %1940 = vmatmul.mubr.bf16.gmra.mrb[24].mxu0 %v812_v26  ;;  %2061 = vmatprep.subr.msk.bf16.mxu0 %vm517_vm1, %v982_v27  ;;  %v941_v26 = vld [vmem:[#allocation2 + $0xa0] sm:$0xff] }
 0x458   : > { %1960 = vmatpush3.bf16.xpose.msra.mxu0 %v1028_v31 }
 0x459   : > { %v2201_v9 = vpop.eup %2200  ;;  %2062 = vmatprep.subr.msk.bf16.mxu0 %vm517_vm1, %v984_v32  ;;  %v942_v32 = vld [vmem:[#allocation2 + $0xa8] sm:$0xff] }
 0x45a   : > { %v954_v8 = vpop.permute.xlu0 %953  ;;  %v803_v11 = vmul.f32 %v2201_v9, %v2624_v0  ;;  %v2203_v33 = vpop.eup %2202 }
 0x45b   : > { %v805_v43 = vmul.f32 %v2203_v33, %v2619_v63  ;;  %v948_v33 = vld [vmem:[#allocation2 + $0xd8] sm:$0xff] }
 0x45c   : > { %v813_v34 = vpack.c.bf16 %v804_v55, %v803_v11 }
 0x45d   : > { %v2205_v35 = vpop.eup %2204 }
 0x45e   : > { %1943 = vmatprep.mubr.bf16.mxu0 %v813_v34  ;;  %v956_v36 = vpop.permute.xlu0 %955  ;;  %v806_v44 = vmul.f32 %v2205_v35, %v2629_v12  ;;  %v1285_v12 = vpop.permute.xlu1 %1284 }
 0x460   : > { %1962 = vmatpush3.bf16.xpose.msra.mxu0 %v1031_v13  ;;  %v814_v15 = vpack.c.bf16 %v806_v44, %v805_v43 }
 0x462   : > { %1944 = vmatmul.mubr.bf16.gmra.mrb[28].mxu0 %v814_v15  ;;  %v958_v19 = vpop.permute.xlu0 %957  ;;  %v946_v15 = vld [vmem:[#allocation2 + $0xc8] sm:$0xff] }
 0x463   : > { %1963 = vmatprep.mubr.msk.bf16.mxu0 %vm517_vm1, %v954_v8  ;;  %v947_v8 = vld [vmem:[#allocation2 + $0xd0] sm:$0xff] }
 0x466   : > { %v960_v0 = vpop.permute.xlu0 %959 }
 0x46a   : > { %1964 = vmatmul.mubr.msk.bf16.vlgmr.msra.gmra.mrb[32].mxu0 %vm517_vm1, %v956_v36  ;;  %v964_v5 = vpop.permute.xlu0 %963  ;;  %v945_v36 = vld [vmem:[#allocation2 + $0xc0] sm:$0xff] }
 0x46b   : > { %1967 = vmatprep.mubr.msk.bf16.mxu0 %vm517_vm1, %v958_v19 }
 0x46e   : > { %v968_v21 = vpop.permute.xlu0 %967 }
 0x472   : > { %1968 = vmatmul.mubr.msk.bf16.gmra.mrb[36].mxu0 %vm517_vm1, %v960_v0  ;;  %v1283_v63 = vpop.permute.xlu0 %1282  ;;  %v951_v0 = vld [vmem:[#allocation2 + $0xf0] sm:$0xff] }
 0x473   : > { %1971 = vmatprep.mubr.msk.bf16.mxu0 %vm517_vm1, %v962_v17  ;;  %1979 = vmatprep.subr.bf16.mxu0 %v1283_v63 }
 0x474   : > { %2031 = vmatprep.subr.bf16.mxu1 %v1283_v63  ;;  %1980 = vmatpush3.bf16.msra.mxu0 %v1283_v63 }
 0x475   : > { %2039 = vmatpush3.bf16.msra.mxu1 %v1283_v63  ;;  %1981 = vmatprep.subr.bf16.mxu0 %v1285_v12  ;;  %v949_v63 = vld [vmem:[#allocation2 + $0xe0] sm:$0xff] }
 0x476   : > { %2032 = vmatprep.subr.bf16.mxu1 %v1285_v12 }
 0x478   : > { %1982 = vmatpush3.bf16.msra.mxu0 %v1285_v12 }
 0x479   : > { %2040 = vmatpush3.bf16.msra.mxu1 %v1285_v12 }
 0x47a   : > { %1972 = vmatmul.mubr.msk.bf16.gmra.mrb[40].mxu0 %vm517_vm1, %v964_v5 }
 0x47b   : > { %1975 = vmatprep.mubr.msk.bf16.mxu0 %vm517_vm1, %v966_v18 }
 0x482   : > { %1976 = vmatmul.mubr.msk.bf16.gmra.mrb[44].mxu0 %vm517_vm1, %v968_v21 }
 0x4b1   : > { %v2692_v22 = vpop.f32.mrb[16].mxu0 }
 0x4b2   : > { %v2694_v45 = vpop.f32.mrb[17].mxu0 }
 0x4b3   : > { %v2696_v46 = vpop.f32.mrb[18].mxu0 }
 0x4b4   : > { %v2698_v47 = vpop.f32.mrb[19].mxu0 }
 0x4e6   : > { %v2700_v48 = vpop.f32.mrb[20].mxu0 }
 0x4e7   : > { %v2702_v20 = vpop.f32.mrb[21].mxu0 }
 0x4e8   : > { %v2704_v52 = vpop.f32.mrb[22].mxu0 }
 0x4e9   : > { %v2706_v53 = vpop.f32.mrb[23].mxu0 }
 0x52a   : > { %v2708_v54 = vpop.f32.mrb[24].mxu0 }
 0x52b   : > { %v2710_v57 = vpop.f32.mrb[25].mxu0 }
 0x52c   : > { %v2712_v58 = vpop.f32.mrb[26].mxu0 }
 0x52d   : > { %v2714_v61 = vpop.f32.mrb[27].mxu0 }
 0x535   : > { %v2716_v62 = vpop.f32.mrb[28].mxu0 }
 0x536   : > { %v2718_v1 = vpop.f32.mrb[29].mxu0 }
 0x537   : > { %v2720_v3 = vpop.f32.mrb[30].mxu0 }
 0x538   : > { %v2722_v4 = vpop.f32.mrb[31].mxu0 }
 0x53d   : > { %v1965_v38 = vpop.f32.mrb[32].mxu0 }
 0x53e   : > { %v2724_v42 = vadd.f32 %v1965_v38, %v939_v41  ;;  %v1067_v37 = vpop.f32.mrb[33].mxu0  ;;  %v952_v38 = vld [vmem:[#allocation2 + $0xf8] sm:$0xff] }
 0x53f   : > { %v2726_v6 = vadd.f32 %v1067_v37, %v937_v51  ;;  %v1966_v7 = vpop.f32.mrb[34].mxu0 }
 0x540   : > { %1134 = vmax.xlane.f32.xlu0 %v2724_v42  ;;  %v1070_v60 = vpop.f32.mrb[35].mxu0  ;;  %v2732_v10 = vadd.f32 %v1966_v7, %v940_v56 }
 0x541   : > { %v2729_v59 = vadd.f32 %v1070_v60, %v938_v2  ;;  %1130 = vmax.xlane.f32.xlu1 %v2726_v6  ;;  %v950_v2 = vld [vmem:[#allocation2 + $0xe8] sm:$0xff] }
 0x544   : > { %1132 = vmax.xlane.f32.xlu0 %v2729_v59 }
 0x545   : > { %1136 = vmax.xlane.f32.xlu1 %v2732_v10  ;;  %v1969_v16 = vpop.f32.mrb[36].mxu0 }
 0x546   : > { %v2736_v24 = vadd.f32 %v1969_v16, %v943_v14  ;;  %v1083_v25 = vpop.f32.mrb[37].mxu0 }
 0x547   : > { %v1970_v27 = vpop.f32.mrb[38].mxu0  ;;  %v2741_v9 = vadd.f32 %v1083_v25, %v941_v26 }
 0x548   : > { %v2738_v28 = vadd.f32 %v1970_v27, %v944_v23  ;;  %1142 = vmax.xlane.f32.xlu0 %v2736_v24  ;;  %v1086_v31 = vpop.f32.mrb[39].mxu0 }
 0x549   : > { %v2744_v11 = vadd.f32 %v1086_v31, %v942_v32 }
 0x54a   : > { %1144 = vmax.xlane.f32.xlu1 %v2738_v28 }
 0x54c   : > { %1138 = vmax.xlane.f32.xlu0 %v2741_v9 }
 0x54d   : > { %v1973_v55 = vpop.f32.mrb[40].mxu0 }
 0x54e   : > { %v2747_v34 = vadd.f32 %v1973_v55, %v947_v8  ;;  %1140 = vmax.xlane.f32.xlu1 %v2744_v11  ;;  %v1099_v35 = vpop.f32.mrb[41].mxu0 }
 0x54f   : > { %v1974_v43 = vpop.f32.mrb[42].mxu0  ;;  %v2753_v19 = vadd.f32 %v1099_v35, %v945_v36 }
 0x550   : > { %v2750_v44 = vadd.f32 %v1974_v43, %v948_v33  ;;  %1150 = vmax.xlane.f32.xlu0 %v2747_v34  ;;  %v1102_v13 = vpop.f32.mrb[43].mxu0 }
 0x551   : > { %v2756_v17 = vadd.f32 %v1102_v13, %v946_v15 }
 0x552   : > { %1152 = vmax.xlane.f32.xlu1 %v2750_v44 }
 0x554   : > { %1146 = vmax.xlane.f32.xlu0 %v2753_v19 }
 0x555   : > { %v1977_v5 = vpop.f32.mrb[44].mxu0 }
 0x556   : > { %v2759_v18 = vadd.f32 %v1977_v5, %v951_v0  ;;  %1148 = vmax.xlane.f32.xlu1 %v2756_v17  ;;  %v1115_v21 = vpop.f32.mrb[45].mxu0 }
 0x557   : > { %v1978_v12 = vpop.f32.mrb[46].mxu0  ;;  %v2763_v51 = vadd.f32 %v1115_v21, %v949_v63 }
 0x558   : > { %1158 = vmax.xlane.f32.xlu0 %v2759_v18  ;;  %v1118_v41 = vpop.f32.mrb[47].mxu0  ;;  %v2774_v37 = vadd.f32 %v1978_v12, %v952_v38 }
 0x559   : > { %v2777_v7 = vadd.f32 %v1118_v41, %v950_v2 }
 0x55c   : > { %1154 = vmax.xlane.f32.xlu0 %v2763_v51 }
 0x567   : > { %1290 = vrot.lane.b32.xlu1 %v2444_v40, %s2317_s7 }
 0x572   : > { %1286 = vrot.lane.b32.xlu0 %v2436_v30, %s2317_s7 }
 0x576   : > { %1288 = vrot.lane.b32.xlu0 %v2434_v29, %s2317_s7 }
 0x57a   : > { %1294 = vrot.lane.b32.xlu0 %v2452_v50, %s2317_s7 }
 0x58b   : > { %1160 = vmax.xlane.f32.xlu1 %v2774_v37 }
 0x58f   : > { %1156 = vmax.xlane.f32.xlu1 %v2777_v7 }
 0x5a0   : > { %1292 = vrot.lane.b32.xlu1 %v2442_v39, %s2317_s7 }
 0x5cd   : > { %v1135_v30 = vpop.xlane.xlu0 %1134 }
 0x5ce   : > { %v1164_v40 = vsub.f32 %v2724_v42, %v1135_v30  ;;  %v1131_v29 = vpop.xlane.xlu1 %1130 }
 0x5cf   : > { %v1162_v56 = vsub.f32 %v2726_v6, %v1131_v29 }
 0x5d0   : > { %v1182_v50 = vmul.f32 1.442695, %v1164_v40 }
 0x5d1   : > { %v1133_v60 = vpop.xlane.xlu0 %1132  ;;  %v1178_v14 = vmul.f32 1.442695, %v1162_v56 }
 0x5d2   : > { %2206 = vpow2.f32 %v1182_v50  ;;  %v1137_v16 = vpop.xlane.xlu1 %1136  ;;  %v1163_v25 = vsub.f32 %v2729_v59, %v1133_v60 }
 0x5d3   : > { %v1165_v23 = vsub.f32 %v2732_v10, %v1137_v16  ;;  %2208 = vpow2.f32 %v1178_v14 }
 0x5d4   : > { %v1180_v42 = vmul.f32 1.442695, %v1163_v25 }
 0x5d5   : > { %v1184_v26 = vmul.f32 1.442695, %v1165_v23  ;;  %v1143_v27 = vpop.xlane.xlu0 %1142 }
 0x5d6   : > { %v1168_v39 = vsub.f32 %v2736_v24, %v1143_v27 }
 0x5d7   : > { %v1145_v31 = vpop.xlane.xlu1 %1144  ;;  %2210 = vpow2.f32 %v1184_v26 }
 0x5d8   : > { %v1190_v32 = vmul.f32 1.442695, %v1168_v39  ;;  %v1169_v6 = vsub.f32 %v2738_v28, %v1145_v31 }
 0x5d9   : > { %v1139_v8 = vpop.xlane.xlu0 %1138 }
 0x5da   : > { %2212 = vpow2.f32 %v1190_v32  ;;  %v1166_v55 = vsub.f32 %v2741_v9, %v1139_v8  ;;  %v1192_v36 = vmul.f32 1.442695, %v1169_v6 }
 0x5db   : > { %v1141_v33 = vpop.xlane.xlu1 %1140  ;;  %2214 = vpow2.f32 %v1180_v42 }
 0x5dc   : > { %v2789_v35 = vpop.eup %2206  ;;  %v1186_v10 = vmul.f32 1.442695, %v1166_v55  ;;  %v1167_v59 = vsub.f32 %v2744_v11, %v1141_v33 }
 0x5dd   : > { %1214 = vadd.xlane.f32.xlu1 %v2789_v35  ;;  %v1151_v24 = vpop.xlane.xlu0 %1150  ;;  %v2794_v15 = vpop.eup %2208 }
 0x5de   : > { %2216 = vpow2.f32 %v1186_v10  ;;  %v1188_v43 = vmul.f32 1.442695, %v1167_v59  ;;  %v1172_v13 = vsub.f32 %v2747_v34, %v1151_v24 }
 0x5df   : > { %v1153_v28 = vpop.xlane.xlu1 %1152  ;;  %2218 = vpow2.f32 %v1192_v36 }
 0x5e0   : > { %2220 = vpow2.f32 %v1188_v43  ;;  %v1198_v0 = vmul.f32 1.442695, %v1172_v13  ;;  %v1173_v34 = vsub.f32 %v2750_v44, %v1153_v28 }
 0x5e1   : > { %1210 = vadd.xlane.f32.xlu1 %v2794_v15  ;;  %v1147_v9 = vpop.xlane.xlu0 %1146  ;;  %v2798_v5 = vpop.eup %2210 }
 0x5e2   : > { %v1170_v11 = vsub.f32 %v2753_v19, %v1147_v9  ;;  %2222 = vpow2.f32 %v1198_v0 }
 0x5e3   : > { %v1149_v21 = vpop.xlane.xlu1 %1148 }
 0x5e4   : > { %v2800_v63 = vpop.eup %2212  ;;  %v1171_v12 = vsub.f32 %v2756_v17, %v1149_v21  ;;  %v1194_v38 = vmul.f32 1.442695, %v1170_v11  ;;  %v1200_v17 = vmul.f32 1.442695, %v1173_v34 }
 0x5e5   : > { %1216 = vadd.xlane.f32.xlu1 %v2798_v5  ;;  %1222 = vadd.xlane.f32.xlu0 %v2800_v63  ;;  %v1159_v41 = vpop.xlane.xlu0 %1158  ;;  %v2807_v19 = vpop.eup %2214 }
 0x5e6   : > { %v1196_v2 = vmul.f32 1.442695, %v1171_v12  ;;  %v1176_v30 = vsub.f32 %v2759_v18, %v1159_v41 }
 0x5e7   : > { %v1291_v25 = vpop.permute.xlu1 %1290 }
 0x5e8   : > { %v2809_v40 = vpop.eup %2216  ;;  %2224 = vpow2.f32 %v1196_v2  ;;  %v1206_v29 = vmul.f32 1.442695, %v1176_v30 }
 0x5e9   : > { %1212 = vadd.xlane.f32.xlu1 %v2807_v19  ;;  %1218 = vadd.xlane.f32.xlu0 %v2809_v40  ;;  %v1155_v44 = vpop.xlane.xlu0 %1154  ;;  %2226 = vpow2.f32 %v1194_v38  ;;  %v2814_v50 = vpop.eup %2218 }
 0x5ea   : > { %v1174_v56 = vsub.f32 %v2763_v51, %v1155_v44  ;;  %v2816_v60 = vpop.eup %2220  ;;  %2228 = vpow2.f32 %v1206_v29 }
 0x5eb   : > { %2230 = vpow2.f32 %v1200_v17 }
 0x5ec   : > { %v1202_v18 = vmul.f32 1.442695, %v1174_v56  ;;  %v2820_v16 = vpop.eup %2222 }
 0x5ed   : > { %1220 = vadd.xlane.f32.xlu1 %v2816_v60  ;;  %1224 = vadd.xlane.f32.xlu0 %v2814_v50  ;;  %v1287_v14 = vpop.permute.xlu0 %1286 }
 0x5ee   : > { %1983 = vmatprep.subr.bf16.mxu0 %v1287_v14  ;;  %2033 = vmatprep.subr.bf16.mxu1 %v1287_v14  ;;  %2232 = vpow2.f32 %v1202_v18 }
 0x5ef   : > { %1984 = vmatpush3.bf16.msra.mxu0 %v1287_v14  ;;  %2041 = vmatpush3.bf16.msra.mxu1 %v1287_v14 }
 0x5f1   : > { %1230 = vadd.xlane.f32.xlu0 %v2820_v16  ;;  %v1289_v51 = vpop.permute.xlu0 %1288 }
 0x5f2   : > { %v2823_v23 = vpop.eup %2224  ;;  %1985 = vmatprep.subr.bf16.mxu0 %v1289_v51  ;;  %2034 = vmatprep.subr.bf16.mxu1 %v1289_v51 }
 0x5f3   : > { %1228 = vadd.xlane.f32.xlu1 %v2823_v23  ;;  %1986 = vmatpush3.bf16.msra.mxu0 %v1289_v51  ;;  %v2826_v26 = vpop.eup %2226 }
 0x5f4   : > { %2042 = vmatpush3.bf16.msra.mxu1 %v1289_v51  ;;  %1987 = vmatprep.subr.bf16.mxu0 %v1291_v25  ;;  %v2829_v27 = vpop.eup %2228 }
 0x5f5   : > { %2035 = vmatprep.subr.bf16.mxu1 %v1291_v25  ;;  %1226 = vadd.xlane.f32.xlu0 %v2826_v26  ;;  %v2832_v39 = vpop.eup %2230  ;;  %v1295_v59 = vpop.permute.xlu0 %1294 }
 0x5f7   : > { %1238 = vadd.xlane.f32.xlu1 %v2829_v27  ;;  %1988 = vmatpush3.bf16.msra.mxu0 %v1291_v25 }
 0x5f8   : > { %2043 = vmatpush3.bf16.msra.mxu1 %v1291_v25  ;;  %v2835_v31 = vpop.eup %2232 }
 0x5f9   : > { %1232 = vadd.xlane.f32.xlu0 %v2832_v39 }
 0x5fb   : > { %1234 = vadd.xlane.f32.xlu1 %v2835_v31 }
 0x60c   : > { %1296 = vrot.lane.b32.xlu1 %v2450_v49, %s2317_s7 }
 0x618   : > { %v1161_v32 = vpop.xlane.xlu1 %1160 }
 0x619   : > { %v1177_v6 = vsub.f32 %v2774_v37, %v1161_v32 }
 0x61b   : > { %v1208_v10 = vmul.f32 1.442695, %v1177_v6 }
 0x61c   : > { %v1157_v42 = vpop.xlane.xlu1 %1156 }
 0x61d   : > { %v1175_v8 = vsub.f32 %v2777_v7, %v1157_v42 }
 0x61f   : > { %v1204_v55 = vmul.f32 1.442695, %v1175_v8 }
 0x620   : > { %v1293_v33 = vpop.permute.xlu1 %1292 }
 0x621   : > { %2234 = vpow2.f32 %v1204_v55  ;;  %1989 = vmatprep.subr.bf16.mxu0 %v1293_v33  ;;  %2036 = vmatprep.subr.bf16.mxu1 %v1293_v33 }
 0x622   : > { %1990 = vmatpush3.bf16.msra.mxu0 %v1293_v33  ;;  %2044 = vmatpush3.bf16.msra.mxu1 %v1293_v33  ;;  %2236 = vpow2.f32 %v1208_v10 }
 0x623   : > { %1991 = vmatprep.subr.bf16.mxu0 %v1295_v59  ;;  %2037 = vmatprep.subr.bf16.mxu1 %v1295_v59 }
 0x626   : > { %1992 = vmatpush3.bf16.msra.mxu0 %v1295_v59  ;;  %2045 = vmatpush3.bf16.msra.mxu1 %v1295_v59 }
 0x62b   : > { %v2842_v49 = vpop.eup %2234 }
 0x62c   : > { %1236 = vadd.xlane.f32.xlu0 %v2842_v49  ;;  %v2845_v37 = vpop.eup %2236 }
 0x630   : > { %1240 = vadd.xlane.f32.xlu0 %v2845_v37 }
 0x66a   : > { %v1215_v7 = vpop.xlane.xlu1 %1214 }
 0x66e   : > { %v1211_v36 = vpop.xlane.xlu1 %1210 }
 0x66f   : > { %2238 = vrcp.f32 %v1211_v36 }
 0x672   : > { %v1217_v24 = vpop.xlane.xlu1 %1216  ;;  %v1223_v43 = vpop.xlane.xlu0 %1222 }
 0x676   : > { %v1213_v13 = vpop.xlane.xlu1 %1212  ;;  %v1219_v28 = vpop.xlane.xlu0 %1218 }
 0x677   : > { %2240 = vrcp.f32 %v1213_v13 }
 0x678   : > { %2242 = vrcp.f32 %v1219_v28 }
 0x679   : > { %v2239_v21 = vpop.eup %2238 }
 0x67a   : > { %v1221_v9 = vpop.xlane.xlu1 %1220  ;;  %v1225_v0 = vpop.xlane.xlu0 %1224  ;;  %v1258_v38 = vmul.f32 %v2239_v21, %v2794_v15 }
 0x67b   : > { %2244 = vrcp.f32 %v1221_v9 }
 0x67c   : > { %2246 = vrcp.f32 %v1217_v24 }
 0x67d   : > { %2248 = vrcp.f32 %v1225_v0 }
 0x67e   : > { %v1231_v11 = vpop.xlane.xlu0 %1230  ;;  %2250 = vrcp.f32 %v1215_v7 }
 0x67f   : > { %2252 = vrcp.f32 %v1223_v43 }
 0x680   : > { %v1229_v12 = vpop.xlane.xlu1 %1228 }
 0x681   : > { %v2241_v34 = vpop.eup %2240  ;;  %2254 = vrcp.f32 %v1229_v12 }
 0x682   : > { %v1227_v41 = vpop.xlane.xlu0 %1226  ;;  %v1259_v2 = vmul.f32 %v2241_v34, %v2807_v19  ;;  %v2243_v30 = vpop.eup %2242 }
 0x683   : > { %2256 = vrcp.f32 %v1227_v41  ;;  %v1262_v18 = vmul.f32 %v2243_v30, %v2809_v40 }
 0x684   : > { %v1239_v29 = vpop.xlane.xlu1 %1238  ;;  %v1274_v44 = vpack.c.bf16 %v1259_v2, %v1258_v38  ;;  %v2140_v38 = vld [vmem:[%s2958_s4] sm:$0xff]  }
 0x685   : > { %v2245_v17 = vpop.eup %2244 }
 0x686   : > { %1995 = vmatprep.mubr.bf16.mxu0 %v1274_v44  ;;  %v1233_v56 = vpop.xlane.xlu0 %1232  ;;  %v1263_v14 = vmul.f32 %v2245_v17, %v2816_v60  ;;  %v2247_v51 = vpop.eup %2246 }
 0x687   : > { %2258 = vrcp.f32 %v1233_v56  ;;  %v2249_v25 = vpop.eup %2248  ;;  %v1261_v8 = vmul.f32 %v2247_v51, %v2798_v5 }
 0x688   : > { %2260 = vrcp.f32 %v1231_v11  ;;  %v1235_v32 = vpop.xlane.xlu1 %1234  ;;  %v1276_v42 = vpack.c.bf16 %v1263_v14, %v1262_v18  ;;  %v2251_v15 = vpop.eup %2250  ;;  %v1265_v55 = vmul.f32 %v2249_v25, %v2814_v50 }
 0x689   : > { %v2253_v6 = vpop.eup %2252  ;;  %v1260_v40 = vmul.f32 %v2251_v15, %v2789_v35  ;;  %2262 = vrcp.f32 %v1235_v32 }
 0x68a   : > { %1999 = vmatprep.mubr.bf16.mxu1 %v1276_v42  ;;  %v1264_v60 = vmul.f32 %v2253_v6, %v2800_v63 }
 0x68b   : > { %v2255_v19 = vpop.eup %2254  ;;  %v1275_v36 = vpack.c.bf16 %v1261_v8, %v1260_v40 }
 0x68c   : > { %v1297_v33 = vpop.permute.xlu1 %1296  ;;  %v1267_v7 = vmul.f32 %v2255_v19, %v2823_v23  ;;  %v1277_v24 = vpack.c.bf16 %v1265_v55, %v1264_v60 }
 0x68d   : > { %v2257_v10 = vpop.eup %2256  ;;  %1993 = vmatprep.subr.bf16.mxu0 %v1297_v33  ;;  %2038 = vmatprep.subr.bf16.mxu1 %v1297_v33 }
 0x68e   : > { %1994 = vmatpush3.bf16.msra.mxu0 %v1297_v33  ;;  %2046 = vmatpush3.bf16.msra.mxu1 %v1297_v33  ;;  %v1266_v59 = vmul.f32 %v2257_v10, %v2826_v26 }
 0x68f   : > { %2011 = vmatprep.subr.bf16.mxu1 %v2140_v38 }
 0x690   : > { %v1278_v43 = vpack.c.bf16 %v1267_v7, %v1266_v59 }
 0x691   : > { %v2259_v5 = vpop.eup %2258  ;;  %1996 = vmatmul.mubr.bf16.vlgmr.msra.gmra.mrb[48].mxu0 %v1275_v36  ;;  %2000 = vmatmul.mubr.bf16.vlgmr.msra.gmra.mrb[16].mxu1 %v1277_v24 }
 0x692   : > { %v2261_v50 = vpop.eup %2260  ;;  %2003 = vmatprep.mubr.bf16.mxu1 %v1278_v43  ;;  %v1269_v35 = vmul.f32 %v2259_v5, %v2832_v39  ;;  %2012 = vmatpush3.bf16.msra.mxu1 %v2140_v38 }
 0x693   : > { %v1268_v63 = vmul.f32 %v2261_v50, %v2820_v16  ;;  %v2263_v23 = vpop.eup %2262 }
 0x694   : > { %v1270_v0 = vmul.f32 %v2263_v23, %v2835_v31  ;;  %v2141_v31 = vld [vmem:[%s2958_s4 + $0x8] sm:$0xff]  }
 0x695   : > { %v1279_v13 = vpack.c.bf16 %v1269_v35, %v1268_v63  ;;  %2013 = vmatprep.subr.bf16.mxu1 %v2141_v31 }
 0x696   : > { %2014 = vmatpush3.bf16.msra.mxu1 %v2141_v31 }
 0x699   : > { %2004 = vmatmul.mubr.bf16.gmra.mrb[20].mxu1 %v1279_v13 }
 0x6b9   : > { %v1237_v28 = vpop.xlane.xlu0 %1236 }
 0x6ba   : > { %2264 = vrcp.f32 %v1237_v28 }
 0x6bb   : > { %2266 = vrcp.f32 %v1239_v29 }
 0x6bd   : > { %v1241_v26 = vpop.xlane.xlu0 %1240 }
 0x6be   : > { %2268 = vrcp.f32 %v1241_v26 }
 0x6c4   : > { %v2265_v9 = vpop.eup %2264 }
 0x6c5   : > { %v1271_v11 = vmul.f32 %v2265_v9, %v2842_v49  ;;  %v2267_v21 = vpop.eup %2266 }
 0x6c6   : > { %v1272_v16 = vmul.f32 %v2267_v21, %v2829_v27 }
 0x6c7   : > { %v1280_v12 = vpack.c.bf16 %v1271_v11, %v1270_v0 }
 0x6c8   : > { %v2269_v34 = vpop.eup %2268 }
 0x6c9   : > { %2007 = vmatprep.mubr.bf16.mxu1 %v1280_v12  ;;  %v1273_v39 = vmul.f32 %v2269_v34, %v2845_v37 }
 0x6cb   : > { %v1281_v41 = vpack.c.bf16 %v1273_v39, %v1272_v16 }
 0x6cd   : > { %2008 = vmatmul.mubr.bf16.gmra.mrb[24].mxu1 %v1281_v41 }
 0x764   : > { %v1997_v49 = vpop.f32.mrb[48].mxu0  ;;  %v2001_v2 = vpop.f32.mrb[16].mxu1 }
 0x765   : > { %v1340_v30 = vpop.f32.mrb[49].mxu0  ;;  %v1356_v27 = vpop.f32.mrb[17].mxu1 }
 0x766   : > { %v1998_v29 = vpop.f32.mrb[50].mxu0  ;;  %v2002_v37 = vpop.f32.mrb[18].mxu1 }
 0x767   : > { %v2095_v44 = vpack.i.bf16 %v1998_v29, %v1997_v49  ;;  %v2105_v17 = vpack.i.bf16 %v2002_v37, %v2001_v2  ;;  %v1343_v56 = vpop.f32.mrb[51].mxu0  ;;  %v1359_v18 = vpop.f32.mrb[19].mxu1 }
 0x768   : > { %v2090_v14 = vpack.i.bf16 %v1343_v56, %v1340_v30  ;;  %v2100_v51 = vpack.i.bf16 %v1359_v18, %v1356_v27 }
 0x769   : > { %2096 = vrot.lane.b32.xlu1 %v2095_v44, %s2318_s12 }
 0x76a   : > { %2091 = vrot.lane.b32.xlu0 %v2090_v14, %s2318_s12 }
 0x76c   : > { %v2005_v25 = vpop.f32.mrb[20].mxu1 }
 0x76d   : > { %2101 = vrot.lane.b32.xlu1 %v2100_v51, %s2318_s12  ;;  %v1372_v32 = vpop.f32.mrb[21].mxu1 }
 0x76e   : > { %2106 = vrot.lane.b32.xlu0 %v2105_v17, %s2318_s12  ;;  %v2006_v42 = vpop.f32.mrb[22].mxu1 }
 0x76f   : > { %v2115_v15 = vpack.i.bf16 %v2006_v42, %v2005_v25  ;;  %v1375_v6 = vpop.f32.mrb[23].mxu1 }
 0x770   : > { %v2110_v19 = vpack.i.bf16 %v1375_v6, %v1372_v32 }
 0x772   : > { %2116 = vrot.lane.b32.xlu0 %v2115_v15, %s2318_s12  ;;  %2111 = vrot.lane.b32.xlu1 %v2110_v19, %s2318_s12 }
 0x7a0   : > { %v2009_v8 = vpop.f32.mrb[24].mxu1 }
 0x7a1   : > { %v1388_v55 = vpop.f32.mrb[25].mxu1 }
 0x7a2   : > { %v2010_v33 = vpop.f32.mrb[26].mxu1 }
 0x7a3   : > { %v2125_v10 = vpack.i.bf16 %v2010_v33, %v2009_v8  ;;  %v1391_v40 = vpop.f32.mrb[27].mxu1 }
 0x7a4   : > { %v2120_v60 = vpack.i.bf16 %v1391_v40, %v1388_v55 }
 0x7a5   : > { %2126 = vrot.lane.b32.xlu0 %v2125_v10, %s2318_s12 }
 0x7a6   : > { %2121 = vrot.lane.b32.xlu1 %v2120_v60, %s2318_s12 }
 0x7db   : > { %v2097_v59 = vpop.permute.xlu1 %2096 }
 0x7dc   : > { %v2099_v7 = vunpack.i.h.bf16 %v2097_v59  ;;  %v2098_v36 = vunpack.i.l.bf16 %v2097_v59  ;;  %v2092_v24 = vpop.permute.xlu0 %2091 }
 0x7dd   : > { %v2094_v43 = vunpack.i.h.bf16 %v2092_v24  ;;  %v2093_v5 = vunpack.i.l.bf16 %v2092_v24 }
 0x7de   : > { %v1470_v50 = vsel %vm517_vm1, %v2696_v46, %v2099_v7  ;;  %v1469_v35 = vsel %vm517_vm1, %v2692_v22, %v2098_v36 }
 0x7df   : > { %v1484_v63 = vpack.c.bf16 %v1470_v50, %v1469_v35  ;;  %v1468_v13 = vsel %vm517_vm1, %v2698_v47, %v2094_v43  ;;  %v1467_v28 = vsel %vm517_vm1, %v2694_v45, %v2093_v5  ;;  %v2102_v26 = vpop.permute.xlu1 %2101 }
 0x7e0   : > { %v1483_v23 = vpack.c.bf16 %v1468_v13, %v1467_v28  ;;  %v2104_v9 = vunpack.i.h.bf16 %v2102_v26  ;;  %v2103_v0 = vunpack.i.l.bf16 %v2102_v26  ;;  %v2107_v11 = vpop.permute.xlu0 %2106 }
 0x7e1   : > { %v2109_v21 = vunpack.i.h.bf16 %v2107_v11  ;;  %v2108_v12 = vunpack.i.l.bf16 %v2107_v11 }
 0x7e2   : > { %v1472_v46 = vsel %vm517_vm1, %v2706_v53, %v2104_v9  ;;  %v1471_v22 = vsel %vm517_vm1, %v2702_v20, %v2103_v0  ;;  %2015 = vmatprep.mubr.msk.bf16.mxu1 %vm347_vm0, %v1483_v23 }
 0x7e3   : > { %v1485_v34 = vpack.c.bf16 %v1472_v46, %v1471_v22  ;;  %v1474_v47 = vsel %vm517_vm1, %v2704_v52, %v2109_v21  ;;  %v1473_v45 = vsel %vm517_vm1, %v2700_v48, %v2108_v12  ;;  %2016 = vmatmul.mubr.msk.bf16.vlgmr.msra.gmra.mrb[28].mxu1 %vm347_vm0, %v1484_v63 }
 0x7e4   : > { %v1486_v16 = vpack.c.bf16 %v1474_v47, %v1473_v45  ;;  %v2112_v39 = vpop.permute.xlu1 %2111  ;;  %v2117_v41 = vpop.permute.xlu0 %2116 }
 0x7e5   : > { %v2114_v38 = vunpack.i.h.bf16 %v2112_v39  ;;  %v2113_v31 = vunpack.i.l.bf16 %v2112_v39  ;;  %v2119_v53 = vunpack.i.h.bf16 %v2117_v41  ;;  %v2118_v49 = vunpack.i.l.bf16 %v2117_v41  ;;  %2019 = vmatprep.mubr.msk.bf16.mxu1 %vm347_vm0, %v1485_v34 }
 0x7e7   : > { %v1476_v20 = vsel %vm517_vm1, %v2714_v61, %v2114_v38  ;;  %v1475_v52 = vsel %vm517_vm1, %v2710_v57, %v2113_v31  ;;  %v1478_v48 = vsel %vm517_vm1, %v2712_v58, %v2119_v53  ;;  %v1477_v2 = vsel %vm517_vm1, %v2708_v54, %v2118_v49 }
 0x7e8   : > { %v1487_v30 = vpack.c.bf16 %v1476_v20, %v1475_v52  ;;  %v1488_v27 = vpack.c.bf16 %v1478_v48, %v1477_v2 }
 0x7eb   : > { %2020 = vmatmul.mubr.msk.bf16.gmra.mrb[32].mxu1 %vm347_vm0, %v1486_v16 }
 0x7ec   : > { %2023 = vmatprep.mubr.msk.bf16.mxu1 %vm347_vm0, %v1487_v30 }
 0x7f3   : > { %2024 = vmatmul.mubr.msk.bf16.gmra.mrb[36].mxu1 %vm347_vm0, %v1488_v27 }
 0x817   : > { %v2127_v29 = vpop.permute.xlu0 %2126 }
 0x818   : > { %v2129_v61 = vunpack.i.h.bf16 %v2127_v29  ;;  %v2128_v37 = vunpack.i.l.bf16 %v2127_v29  ;;  %v2122_v44 = vpop.permute.xlu1 %2121 }
 0x819   : > { %v2124_v57 = vunpack.i.h.bf16 %v2122_v44  ;;  %v2123_v17 = vunpack.i.l.bf16 %v2122_v44 }
 0x81a   : > { %v1482_v58 = vsel %vm517_vm1, %v2720_v3, %v2129_v61  ;;  %v1481_v54 = vsel %vm517_vm1, %v2716_v62, %v2128_v37  ;;  %v1764_v3 = vld [vmem:[%s2959_s5] ss:$0 sm:$0xff] }
 0x81b   : > { %v1490_v56 = vpack.c.bf16 %v1482_v58, %v1481_v54  ;;  %v1480_v18 = vsel %vm517_vm1, %v2722_v4, %v2124_v57  ;;  %v1479_v14 = vsel %vm517_vm1, %v2718_v1, %v2123_v17 }
 0x81c   : > { %v1489_v51 = vpack.c.bf16 %v1480_v18, %v1479_v14 }
 0x81e   : > { %2027 = vmatprep.mubr.msk.bf16.mxu1 %vm347_vm0, %v1489_v51 }
 0x81f   : > { %2028 = vmatmul.mubr.msk.bf16.gmra.mrb[40].mxu1 %vm347_vm0, %v1490_v56 }
 0x8b6   : > { %v2017_v62 = vpop.f32.mrb[28].mxu1 }
 0x8b7   : > { %v1581_v1 = vadd.f32 %v2017_v62, %v1764_v3  ;;  %v1572_v4 = vpop.f32.mrb[29].mxu1 }
 0x8b8   : > { %v1573_v25 = vadd.f32 %v1764_v3, %v1572_v4  ;;  %v2018_v32 = vpop.f32.mrb[30].mxu1 }
 0x8b9   : > { %1637 = vst.msk [vmem:[%s2917_s18 + $0x10] sm:$0xff] %vm347_vm0, %v1581_v1  ;;  %v1584_v42 = vadd.f32 %v2018_v32, %v1764_v3  ;;  %v1575_v15 = vpop.f32.mrb[31].mxu1 }
 0x8ba   : > { %1635 = vst.msk [vmem:[%s2917_s18] sm:$0xff] %vm347_vm0, %v1573_v25  ;;  %v1576_v6 = vadd.f32 %v1764_v3, %v1575_v15 }
 0x8bb   : > { %1638 = vst.msk [vmem:[%s2917_s18 + $0x18] sm:$0xff] %vm347_vm0, %v1584_v42 }
 0x8bc   : > { %1636 = vst.msk [vmem:[%s2917_s18 + $0x8] sm:$0xff] %vm347_vm0, %v1576_v6 }
 0x8be   : > { %v2021_v19 = vpop.f32.mrb[32].mxu1 }
 0x8bf   : > { %v1597_v8 = vadd.f32 %v2021_v19, %v1764_v3  ;;  %v1588_v55 = vpop.f32.mrb[33].mxu1 }
 0x8c0   : > { %v1589_v33 = vadd.f32 %v1764_v3, %v1588_v55  ;;  %v2022_v10 = vpop.f32.mrb[34].mxu1 }
 0x8c1   : > { %1641 = vst.msk [vmem:[%s2917_s18 + $0x30] sm:$0xff] %vm347_vm0, %v1597_v8  ;;  %v1600_v40 = vadd.f32 %v2022_v10, %v1764_v3  ;;  %v1591_v60 = vpop.f32.mrb[35].mxu1 }
 0x8c2   : > { %1639 = vst.msk [vmem:[%s2917_s18 + $0x20] sm:$0xff] %vm347_vm0, %v1589_v33  ;;  %v1592_v59 = vadd.f32 %v1764_v3, %v1591_v60 }
 0x8c3   : > { %1642 = vst.msk [vmem:[%s2917_s18 + $0x38] sm:$0xff] %vm347_vm0, %v1600_v40 }
 0x8c4   : > { %1640 = vst.msk [vmem:[%s2917_s18 + $0x28] sm:$0xff] %vm347_vm0, %v1592_v59 }
 0x8c6   : > { %v2025_v7 = vpop.f32.mrb[36].mxu1 }
 0x8c7   : > { %v1613_v36 = vadd.f32 %v2025_v7, %v1764_v3  ;;  %v1604_v24 = vpop.f32.mrb[37].mxu1 }
 0x8c8   : > { %v1605_v43 = vadd.f32 %v1764_v3, %v1604_v24  ;;  %v2026_v5 = vpop.f32.mrb[38].mxu1 }
 0x8c9   : > { %1645 = vst.msk [vmem:[%s2917_s18 + $0x50] sm:$0xff] %vm347_vm0, %v1613_v36  ;;  %v1616_v50 = vadd.f32 %v2026_v5, %v1764_v3  ;;  %v1607_v35 = vpop.f32.mrb[39].mxu1 }
 0x8ca   : > { %1643 = vst.msk [vmem:[%s2917_s18 + $0x40] sm:$0xff] %vm347_vm0, %v1605_v43  ;;  %v1608_v63 = vadd.f32 %v1764_v3, %v1607_v35 }
 0x8cb   : > { %1646 = vst.msk [vmem:[%s2917_s18 + $0x58] sm:$0xff] %vm347_vm0, %v1616_v50 }
 0x8cc   : > { %1644 = vst.msk [vmem:[%s2917_s18 + $0x48] sm:$0xff] %vm347_vm0, %v1608_v63 }
 0x8f2   : > { %v2029_v13 = vpop.f32.mrb[40].mxu1 }
 0x8f3   : > { %v1629_v28 = vadd.f32 %v2029_v13, %v1764_v3  ;;  %v1620_v26 = vpop.f32.mrb[41].mxu1 }
 0x8f4   : > { %v1621_v23 = vadd.f32 %v1764_v3, %v1620_v26  ;;  %v2030_v9 = vpop.f32.mrb[42].mxu1 }
 0x8f5   : > { %1649 = vst.msk [vmem:[%s2917_s18 + $0x70] sm:$0xff] %vm347_vm0, %v1629_v28  ;;  %v1632_v0 = vadd.f32 %v2030_v9, %v1764_v3  ;;  %v1623_v11 = vpop.f32.mrb[43].mxu1 }
 0x8f6   : > { %1647 = vst.msk [vmem:[%s2917_s18 + $0x60] sm:$0xff] %vm347_vm0, %v1621_v23  ;;  %v1624_v21 = vadd.f32 %v1764_v3, %v1623_v11 }
 0x8f7   : > { %1650 = vst.msk [vmem:[%s2917_s18 + $0x78] sm:$0xff] %vm347_vm0, %v1632_v0 }
 0x8f8   : > { %1648 = vst.msk [vmem:[%s2917_s18 + $0x68] sm:$0xff] %vm347_vm0, %v1624_v21 }
 0x8f9 PF: > { %s17_s21 = sadd.s32 1, %s2308_s21  }
 0x8fa   : > { %p14_p3 = scmp.ge.s32.totalorder %s17_s21, 4  }
 0x8fc   :  { %16 = sbr.rel (!%p14_p3) target bundleno = 1 (0x1), region = 80 }
 0x903   :  { %1672 = vsyncpa [#allocation3], 1 }
 0x904   :  { %1674 = vsyncpa [#allocation3 + $0x1], 1 }

</bundles_post_ra>
